<compile_context>
chip_gen: v7x
topology: tpu7x:2x2x1
jax: 0.10.0
libtpu: 0.0.40
codegen_flags: <defaults>
</compile_context>

<pallas_src>
import functools

import jax
import jax.numpy as jnp
from jax.experimental import pallas as pl
from jax.experimental.pallas import tpu as pltpu


def _round_up(x: int, m: int) -> int:
    return ((x + m - 1) // m) * m


def _vmem_budget_bytes() -> int:
    """Generation-aware VMEM budget: ~75% of physical VMEM, safe fallback 48 MiB."""
    cap = 64 << 20  # conservative fallback == v7x physical VMEM per TensorCore
    try:
        cap = int(pltpu.get_tpu_info().vmem_capacity_bytes)
    except Exception:
        pass
    return max(16 << 20, (cap * 3) // 4)


def _vq_softmax_kernel(x_ref, cbt_ref, cbsq_ref, o_ref, *, precision):
    # x_ref:    (TM, E)      row tile of flattened inputs
    # cbt_ref:  (E, K_pad)   resident codebook, pre-transposed AND pre-scaled by -2
    # cbsq_ref: (1, K_pad)   precomputed ||codebook||^2 (padded cols are -inf)
    # o_ref:    (TM, K_pad)  softmax(distances) tile (lane-dense store)
    dots = jnp.dot(
        x_ref[...], cbt_ref[...],
        preferred_element_type=jnp.float32,
        precision=precision,
    )                                              # = -2 * <x, codebook>  (TM, K_pad)

    # Full distance is ||cb||^2 + ||x||^2 - 2<x,cb>; ||x||^2 is constant per row and
    # softmax(dim=1) is shift-invariant, so it is dropped (exact). Do NOT "fix" this.
    logits = cbsq_ref[...] + dots                  # (TM, K_pad), f32

    m = jnp.max(logits, axis=1, keepdims=True)
    e = jnp.exp(logits - m)                        # padded cols -> exp(-inf) = 0
    denom = jnp.sum(e, axis=1, keepdims=True)      # >= 1 (max column contributes 1)
    o_ref[...] = (e * (1.0 / denom)).astype(o_ref.dtype)


def _build_vq_call(*, n_tiles, tile_m, E, K_pad, N_pad, out_dtype,
                   vmem_limit_bytes, cost, precision, single_buffer_codebook):
    kernel = functools.partial(_vq_softmax_kernel, precision=precision)
    # Grid-invariant operands: single buffer saves one E*K_pad copy of VMEM.
    inv_kwargs = {"pipeline_mode": pl.Buffered(1)} if single_buffer_codebook else {}
    grid_spec = pltpu.PrefetchScalarGridSpec(
        num_scalar_prefetch=0,
        grid=(n_tiles,),
        in_specs=[
            pl.BlockSpec((tile_m, E), lambda i: (i, 0)),          # input row tile
            pl.BlockSpec((E, K_pad), lambda i: (0, 0), **inv_kwargs),  # codebook^T * -2
            pl.BlockSpec((1, K_pad), lambda i: (0, 0), **inv_kwargs),  # ||cb||^2
        ],
        out_specs=pl.BlockSpec((tile_m, K_pad), lambda i: (i, 0)),
    )
    return pl.pallas_call(
        kernel,
        out_shape=jax.ShapeDtypeStruct((N_pad, K_pad), out_dtype),
        grid_spec=grid_spec,
        compiler_params=pltpu.CompilerParams(
            dimension_semantics=("parallel",),
            vmem_limit_bytes=int(vmem_limit_bytes),
        ),
        cost_estimate=cost,
    )


def vector_quantization(inputs, codebook):
    """Pallas implementation of VectorQuantization.forward.

    inputs:   any shape flattening to (N, E)
    codebook: (K, E)
    returns:  (N, K) softmax over codebook entries (dim=1), in the promoted float dtype
    """
    K, E = codebook.shape
    compute_dtype = jnp.promote_types(inputs.dtype, codebook.dtype)
    if not jnp.issubdtype(compute_dtype, jnp.floating):
        compute_dtype = jnp.float32
    x_flat = inputs.reshape(-1, E).astype(compute_dtype)
    cb = codebook.astype(compute_dtype)
    N = x_flat.shape[0]

    out_dtype = compute_dtype
    in_bytes = jnp.dtype(compute_dtype).itemsize
    out_bytes = jnp.dtype(out_dtype).itemsize

    # Lane-dense output: pad the codebook axis up to a multiple of 128.
    K_pad = _round_up(K, 128)

    # --- VMEM-formula tile sizing -------------------------------------------------
    budget = _vmem_budget_bytes()
    # Per tile-row working set: double-buffered input + double-buffered output rows,
    # plus f32 epilogue temporaries (logits / exp) over K_pad.
    per_row = 2 * E * in_bytes + (2 * out_bytes + 12) * K_pad
    resident = 2 * E * K_pad * in_bytes + 2 * K_pad * 4     # codebook^T + ||cb||^2
    avail = budget - resident - (4 << 20)                   # margin for compiler scratch
    if avail < 8 * per_row:
        # TODO(synk): add an online-softmax path that tiles the codebook (K) axis for
        # codebooks too large to keep resident in VMEM.
        raise ValueError(
            f"codebook too large for the K-resident kernel (K={K}, E={E}, "
            f"VMEM budget {budget >> 20} MiB)")
    tile_m = min(((avail // per_row) // 8) * 8, 2048, _round_up(N, 8))
    tile_m = max(tile_m, 8)
    # Keep >= 2 grid steps when possible so dual-TensorCore chips (v7x) can shard the
    # 'parallel' grid axis across both cores.
    if tile_m >= N and N >= 16:
        tile_m = _round_up(pl.cdiv(N, 2), 8)
    n_tiles = pl.cdiv(N, tile_m)
    N_pad = n_tiles * tile_m

    # Skip the extra HBM pass when no row padding is needed.
    x_pad = x_flat if N_pad == N else jnp.pad(x_flat, ((0, N_pad - N), (0, 0)))

    # Precomputed ||codebook||^2 (padded cols -inf -> exp() contributes exactly 0).
    cb_f32 = cb.astype(jnp.float32)
    cb_sqr = jnp.sum(cb_f32 * cb_f32, axis=1)
    cb_sqr_pad = jnp.full((1, K_pad), -jnp.inf, jnp.float32).at[0, :K].set(cb_sqr)
    # Pre-transposed codebook with the -2 folded in (power-of-two scale: exact).
    cb_t = jnp.zeros((E, K_pad), compute_dtype).at[:, :K].set((-2.0 * cb).T)

    cost = pl.CostEstimate(
        flops=2 * N_pad * K_pad * E,
        transcendentals=N_pad * K_pad,
        bytes_accessed=(N_pad * E * in_bytes + E * K_pad * in_bytes
                        + K_pad * 4 + N_pad * K_pad * out_bytes),
    )

    # f32 inputs need full-precision MXU contraction: softmax' exp() amplifies the
    # ~1e-2 logit error of a default (bf16) f32 matmul into percent-level prob errors.
    precision = jax.lax.Precision.HIGHEST if compute_dtype == jnp.float32 else None

    common = dict(n_tiles=n_tiles, tile_m=tile_m, E=E, K_pad=K_pad, N_pad=N_pad,
                  out_dtype=out_dtype, vmem_limit_bytes=budget, cost=cost)
    # Portability ladder: some Pallas versions may not accept pipeline_mode / the dot
    # precision kwarg in the Mosaic path; fall back gracefully instead of failing.
    attempts = (
        dict(precision=precision, single_buffer_codebook=True),
        dict(precision=precision, single_buffer_codebook=False),
        dict(precision=None, single_buffer_codebook=False),
    )
    out_pad = None
    last_err = None
    for opts in attempts:
        try:
            out_pad = _build_vq_call(**common, **opts)(x_pad, cb_t, cb_sqr_pad)
            break
        except Exception as err:  # fall back to the next (more conservative) config
            last_err = err
    if out_pad is None:
        raise last_err

    if N_pad == N and K_pad == K:
        return out_pad                      # no extra HBM pass when already aligned
    return out_pad[:N, :K]


def _reference(inputs, codebook):
    """Pure-JAX replica of the PyTorch module (softmax of +distances, dim=1)."""
    E = codebook.shape[1]
    x = inputs.reshape(-1, E).astype(jnp.float32)
    cb = codebook.astype(jnp.float32)
    dist = (
        jnp.sum(x * x, axis=1, keepdims=True)
        + jnp.sum(cb * cb, axis=1)[None, :]
        - 2.0 * jnp.dot(x, cb.T, precision=jax.lax.Precision.HIGHEST)
    )
    return jax.nn.softmax(dist, axis=1)


if __name__ == "__main__":
    key = jax.random.PRNGKey(0)
    k_in, k_cb = jax.random.split(key)

    # Small VQ-VAE-like shapes: inputs (B, H, W, E) with E = embedding_size.
    B, H, W, E = 2, 8, 8, 32
    K = 64  # codebook entries

    inputs = jax.random.normal(k_in, (B, H, W, E), dtype=jnp.float32)
    codebook = jax.random.normal(k_cb, (K, E), dtype=jnp.float32)

    out = vector_quantization(inputs, codebook)
    out = jax.block_until_ready(out)

    ref = _reference(inputs, codebook)
    assert out.shape == (B * H * W, K)
    err = float(jnp.max(jnp.abs(out - ref)))
    assert err < 2e-3, f"max abs error vs reference: {err}"

    print("KERNEL_OK")
</pallas_src>

<mosaic_0001>
module attributes {stable_mosaic.version = 11 : i64} {
  func.func @_vq_softmax_kernel(%arg0: i32, %arg1: memref<64x32xf32, #tpu.memory_space<vmem>>, %arg2: memref<32x128xf32, #tpu.memory_space<vmem>>, %arg3: memref<1x128xf32, #tpu.memory_space<vmem>>, %arg4: memref<64x128xf32, #tpu.memory_space<vmem>>) attributes {dimension_semantics = [#tpu.dimension_semantics<parallel>], iteration_bounds = array<i64: 2>, scalar_prefetch = 0 : i64, scratch_operands = 0 : i64, tpu.core_type = #tpu.core_type<tc>, window_params = [{transform_indices = @transform_0, window_bounds = array<i64: 64, 32>}, {pipeline_mode = #tpu.pipeline_mode<synchronous>, transform_indices = @transform_1, window_bounds = array<i64: 32, 128>}, {pipeline_mode = #tpu.pipeline_mode<synchronous>, transform_indices = @transform_2, window_bounds = array<i64: 1, 128>}, {transform_indices = @transform_3, window_bounds = array<i64: 64, 128>}]} {
    %c0 = arith.constant 0 : index
    %c0_0 = arith.constant 0 : index
    %0 = vector.load %arg1[%c0, %c0_0] : memref<64x32xf32, #tpu.memory_space<vmem>>, vector<64x32xf32>
    %c0_1 = arith.constant 0 : index
    %c0_2 = arith.constant 0 : index
    %1 = vector.load %arg2[%c0_1, %c0_2] : memref<32x128xf32, #tpu.memory_space<vmem>>, vector<32x128xf32>
    %cst = arith.constant dense<0.000000e+00> : vector<64x128xf32>
    %2 = tpu.matmul %0, %1, %cst {dimension_numbers = #tpu.dot_dimension_numbers<[1], [0], [0], [1], [0, 0, 1, 1], [], []>, precision = #tpu.contract_precision<fp32>} : vector<64x32xf32>, vector<32x128xf32>, vector<64x128xf32> -> vector<64x128xf32>
    %c0_3 = arith.constant 0 : index
    %c0_4 = arith.constant 0 : index
    %3 = vector.load %arg3[%c0_3, %c0_4] : memref<1x128xf32, #tpu.memory_space<vmem>>, vector<1x128xf32>
    %4 = vector.broadcast %3 : vector<1x128xf32> to vector<64x128xf32>
    %5 = arith.addf %4, %2 : vector<64x128xf32>
    %cst_5 = arith.constant dense<0xFF800000> : vector<64xf32>
    %6 = vector.multi_reduction <maximumf>, %5, %cst_5 [1] : vector<64x128xf32> to vector<64xf32>
    %7 = vector.shape_cast %6 : vector<64xf32> to vector<64x1xf32>
    %8 = vector.broadcast %7 : vector<64x1xf32> to vector<64x128xf32>
    %9 = arith.subf %5, %8 : vector<64x128xf32>
    %10 = math.exp %9 : vector<64x128xf32>
    %cst_6 = arith.constant dense<0.000000e+00> : vector<64xf32>
    %11 = vector.multi_reduction <add>, %10, %cst_6 [1] : vector<64x128xf32> to vector<64xf32>
    %12 = vector.shape_cast %11 : vector<64xf32> to vector<64x1xf32>
    %cst_7 = arith.constant 1.000000e+00 : f32
    %13 = vector.broadcast %cst_7 : f32 to vector<64x1xf32>
    %14 = arith.divf %13, %12 : vector<64x1xf32>
    %15 = vector.broadcast %14 : vector<64x1xf32> to vector<64x128xf32>
    %16 = arith.mulf %10, %15 : vector<64x128xf32>
    %c0_8 = arith.constant 0 : index
    %c0_9 = arith.constant 0 : index
    %17 = vector.load %arg4[%c0_8, %c0_9] : memref<64x128xf32, #tpu.memory_space<vmem>>, vector<64x128xf32>
    tpu.vector_store %arg4[%c0_8, %c0_9], %16 {strides = array<i32>} : memref<64x128xf32, #tpu.memory_space<vmem>>, vector<64x128xf32>,
    return
  }
  func.func @transform_0(%arg0: i32) -> (i32, i32) {
    %c0_i32 = arith.constant 0 : i32
    %c0_i32_0 = arith.constant 0 : i32
    return %arg0, %c0_i32 : i32, i32
  }
  func.func @transform_1(%arg0: i32) -> (i32, i32) {
    %c0_i32 = arith.constant 0 : i32
    %c0_i32_0 = arith.constant 0 : i32
    %c0_i32_1 = arith.constant 0 : i32
    return %c0_i32, %c0_i32_0 : i32, i32
  }
  func.func @transform_2(%arg0: i32) -> (i32, i32) {
    %c0_i32 = arith.constant 0 : i32
    %c0_i32_0 = arith.constant 0 : i32
    %c0_i32_1 = arith.constant 0 : i32
    return %c0_i32, %c0_i32_0 : i32, i32
  }
  func.func @transform_3(%arg0: i32) -> (i32, i32) {
    %c0_i32 = arith.constant 0 : i32
    %c0_i32_0 = arith.constant 0 : i32
    return %arg0, %c0_i32 : i32, i32
  }
}

module attributes {stable_mosaic.version = 11 : i64} {
  func.func @_vq_softmax_kernel(%arg0: i32, %arg1: memref<64x32xf32, #tpu.memory_space<vmem>>, %arg2: memref<32x128xf32, #tpu.memory_space<vmem>>, %arg3: memref<1x128xf32, #tpu.memory_space<vmem>>, %arg4: memref<64x128xf32, #tpu.memory_space<vmem>>) attributes {dimension_semantics = [#tpu.dimension_semantics<parallel>], iteration_bounds = array<i64: 2>, scalar_prefetch = 0 : i64, scratch_operands = 0 : i64, tpu.core_type = #tpu.core_type<tc>, window_params = [{transform_indices = @transform_0, window_bounds = array<i64: 64, 32>}, {pipeline_mode = #tpu.pipeline_mode<synchronous>, transform_indices = @transform_1, window_bounds = array<i64: 32, 128>}, {pipeline_mode = #tpu.pipeline_mode<synchronous>, transform_indices = @transform_2, window_bounds = array<i64: 1, 128>}, {transform_indices = @transform_3, window_bounds = array<i64: 64, 128>}]} {
    %c0 = arith.constant 0 : index
    %c0_0 = arith.constant 0 : index
    %0 = vector.load %arg1[%c0, %c0_0] : memref<64x32xf32, #tpu.memory_space<vmem>>, vector<64x32xf32>
    %c0_1 = arith.constant 0 : index
    %c0_2 = arith.constant 0 : index
    %1 = vector.load %arg2[%c0_1, %c0_2] : memref<32x128xf32, #tpu.memory_space<vmem>>, vector<32x128xf32>
    %cst = arith.constant dense<0.000000e+00> : vector<64x128xf32>
    %2 = tpu.matmul %0, %1, %cst {dimension_numbers = #tpu.dot_dimension_numbers<[1], [0], [0], [1], [0, 0, 1, 1], [], []>, precision = #tpu.contract_precision<fp32>} : vector<64x32xf32>, vector<32x128xf32>, vector<64x128xf32> -> vector<64x128xf32>
    %c0_3 = arith.constant 0 : index
    %c0_4 = arith.constant 0 : index
    %3 = vector.load %arg3[%c0_3, %c0_4] : memref<1x128xf32, #tpu.memory_space<vmem>>, vector<1x128xf32>
    %4 = vector.broadcast %3 : vector<1x128xf32> to vector<64x128xf32>
    %5 = arith.addf %4, %2 : vector<64x128xf32>
    %cst_5 = arith.constant dense<0xFF800000> : vector<64xf32>
    %6 = vector.multi_reduction <maximumf>, %5, %cst_5 [1] : vector<64x128xf32> to vector<64xf32>
    %7 = vector.shape_cast %6 : vector<64xf32> to vector<64x1xf32>
    %8 = vector.broadcast %7 : vector<64x1xf32> to vector<64x128xf32>
    %9 = arith.subf %5, %8 : vector<64x128xf32>
    %10 = math.exp %9 : vector<64x128xf32>
    %cst_6 = arith.constant dense<0.000000e+00> : vector<64xf32>
    %11 = vector.multi_reduction <add>, %10, %cst_6 [1] : vector<64x128xf32> to vector<64xf32>
    %12 = vector.shape_cast %11 : vector<64xf32> to vector<64x1xf32>
    %cst_7 = arith.constant 1.000000e+00 : f32
    %13 = vector.broadcast %cst_7 : f32 to vector<64x1xf32>
    %14 = arith.divf %13, %12 : vector<64x1xf32>
    %15 = vector.broadcast %14 : vector<64x1xf32> to vector<64x128xf32>
    %16 = arith.mulf %10, %15 : vector<64x128xf32>
    %c0_8 = arith.constant 0 : index
    %c0_9 = arith.constant 0 : index
    %17 = vector.load %arg4[%c0_8, %c0_9] : memref<64x128xf32, #tpu.memory_space<vmem>>, vector<64x128xf32>
    tpu.vector_store %arg4[%c0_8, %c0_9], %16 {strides = array<i32>} : memref<64x128xf32, #tpu.memory_space<vmem>>, vector<64x128xf32>,
    return
  }
  func.func @transform_0(%arg0: i32) -> (i32, i32) {
    %c0_i32 = arith.constant 0 : i32
    %c0_i32_0 = arith.constant 0 : i32
    return %arg0, %c0_i32 : i32, i32
  }
  func.func @transform_1(%arg0: i32) -> (i32, i32) {
    %c0_i32 = arith.constant 0 : i32
    %c0_i32_0 = arith.constant 0 : i32
    %c0_i32_1 = arith.constant 0 : i32
    return %c0_i32, %c0_i32_0 : i32, i32
  }
  func.func @transform_2(%arg0: i32) -> (i32, i32) {
    %c0_i32 = arith.constant 0 : i32
    %c0_i32_0 = arith.constant 0 : i32
    %c0_i32_1 = arith.constant 0 : i32
    return %c0_i32, %c0_i32_0 : i32, i32
  }
  func.func @transform_3(%arg0: i32) -> (i32, i32) {
    %c0_i32 = arith.constant 0 : i32
    %c0_i32_0 = arith.constant 0 : i32
    return %arg0, %c0_i32 : i32, i32
  }
}

module attributes {stable_mosaic.version = 11 : i64} {
  func.func @_vq_softmax_kernel(%arg0: i32, %arg1: memref<64x32xf32, #tpu.memory_space<vmem>>, %arg2: memref<32x128xf32, #tpu.memory_space<vmem>>, %arg3: memref<1x128xf32, #tpu.memory_space<vmem>>, %arg4: memref<64x128xf32, #tpu.memory_space<vmem>>) attributes {dimension_semantics = [#tpu.dimension_semantics<parallel>], iteration_bounds = array<i64: 2>, scalar_prefetch = 0 : i64, scratch_operands = 0 : i64, tpu.core_type = #tpu.core_type<tc>, window_params = [{transform_indices = @transform_0, window_bounds = array<i64: 64, 32>}, {pipeline_mode = #tpu.pipeline_mode<synchronous>, transform_indices = @transform_1, window_bounds = array<i64: 32, 128>}, {pipeline_mode = #tpu.pipeline_mode<synchronous>, transform_indices = @transform_2, window_bounds = array<i64: 1, 128>}, {transform_indices = @transform_3, window_bounds = array<i64: 64, 128>}]} {
    %c0 = arith.constant 0 : index
    %c0_0 = arith.constant 0 : index
    %0 = vector.load %arg1[%c0, %c0_0] : memref<64x32xf32, #tpu.memory_space<vmem>>, vector<64x32xf32>
    %c0_1 = arith.constant 0 : index
    %c0_2 = arith.constant 0 : index
    %1 = vector.load %arg2[%c0_1, %c0_2] : memref<32x128xf32, #tpu.memory_space<vmem>>, vector<32x128xf32>
    %cst = arith.constant dense<0.000000e+00> : vector<64x128xf32>
    %2 = tpu.matmul %0, %1, %cst {dimension_numbers = #tpu.dot_dimension_numbers<[1], [0], [0], [1], [0, 0, 1, 1], [], []>} : vector<64x32xf32>, vector<32x128xf32>, vector<64x128xf32> -> vector<64x128xf32>
    %c0_3 = arith.constant 0 : index
    %c0_4 = arith.constant 0 : index
    %3 = vector.load %arg3[%c0_3, %c0_4] : memref<1x128xf32, #tpu.memory_space<vmem>>, vector<1x128xf32>
    %4 = vector.broadcast %3 : vector<1x128xf32> to vector<64x128xf32>
    %5 = arith.addf %4, %2 : vector<64x128xf32>
    %cst_5 = arith.constant dense<0xFF800000> : vector<64xf32>
    %6 = vector.multi_reduction <maximumf>, %5, %cst_5 [1] : vector<64x128xf32> to vector<64xf32>
    %7 = vector.shape_cast %6 : vector<64xf32> to vector<64x1xf32>
    %8 = vector.broadcast %7 : vector<64x1xf32> to vector<64x128xf32>
    %9 = arith.subf %5, %8 : vector<64x128xf32>
    %10 = math.exp %9 : vector<64x128xf32>
    %cst_6 = arith.constant dense<0.000000e+00> : vector<64xf32>
    %11 = vector.multi_reduction <add>, %10, %cst_6 [1] : vector<64x128xf32> to vector<64xf32>
    %12 = vector.shape_cast %11 : vector<64xf32> to vector<64x1xf32>
    %cst_7 = arith.constant 1.000000e+00 : f32
    %13 = vector.broadcast %cst_7 : f32 to vector<64x1xf32>
    %14 = arith.divf %13, %12 : vector<64x1xf32>
    %15 = vector.broadcast %14 : vector<64x1xf32> to vector<64x128xf32>
    %16 = arith.mulf %10, %15 : vector<64x128xf32>
    %c0_8 = arith.constant 0 : index
    %c0_9 = arith.constant 0 : index
    %17 = vector.load %arg4[%c0_8, %c0_9] : memref<64x128xf32, #tpu.memory_space<vmem>>, vector<64x128xf32>
    tpu.vector_store %arg4[%c0_8, %c0_9], %16 {strides = array<i32>} : memref<64x128xf32, #tpu.memory_space<vmem>>, vector<64x128xf32>,
    return
  }
  func.func @transform_0(%arg0: i32) -> (i32, i32) {
    %c0_i32 = arith.constant 0 : i32
    %c0_i32_0 = arith.constant 0 : i32
    return %arg0, %c0_i32 : i32, i32
  }
  func.func @transform_1(%arg0: i32) -> (i32, i32) {
    %c0_i32 = arith.constant 0 : i32
    %c0_i32_0 = arith.constant 0 : i32
    %c0_i32_1 = arith.constant 0 : i32
    return %c0_i32, %c0_i32_0 : i32, i32
  }
  func.func @transform_2(%arg0: i32) -> (i32, i32) {
    %c0_i32 = arith.constant 0 : i32
    %c0_i32_0 = arith.constant 0 : i32
    %c0_i32_1 = arith.constant 0 : i32
    return %c0_i32, %c0_i32_0 : i32, i32
  }
  func.func @transform_3(%arg0: i32) -> (i32, i32) {
    %c0_i32 = arith.constant 0 : i32
    %c0_i32_0 = arith.constant 0 : i32
    return %arg0, %c0_i32 : i32, i32
  }
}

</mosaic_0001>

<bundles_post_ra>
// kernel: tpu_custom_call.1
= control target key start
LH: loop header
LB: loop body
LE: loop exit
PB: predicated region body
PF: predicated region fallthrough
CT: control target
= control target key end

     0   :  { %8 = vsyncpa [#allocation3], 0  ;;  %s1895_s0 = inlined_call_operand.vmem [shape: f32[128,32], index: 0, kind: input, shape index: {}]   ;;  %s1896_s1 = inlined_call_operand.vmem [shape: f32[32,128], index: 1, kind: input, shape index: {}]   ;;  %s1897_s2 = inlined_call_operand.vmem [shape: f32[1,128], index: 2, kind: input, shape index: {}]   ;;  %s1898_s3 = inlined_call_operand.hbm [shape: f32[128,128], index: 3, kind: output, shape index: {}]  }
   0x1   :  { %10 = vsyncpa [#allocation3 + $0x1], 0  ;;  %s1628_s12 = smov 0   ;;  %s1630_s13 = smov 0  }
   0x2   :  { %s1632_s14 = smov 0   ;;  %s1634_s15 = smov 0  }
   0x3 LB: > { %s1649_s16 = sadd.s32 4294967295, %s1603_s15   ;;  %s1174_s17 = sadd.s32 4294967294, %s1603_s15   ;;  %s1603_s15 = sphi %s1634_s15, %s1904_s15   ;;  %s1599_s14 = sphi %s1632_s14, %s1903_s14   ;;  %s1595_s13 = sphi %s1630_s13, %s1902_s13   ;;  %s1591_s12 = sphi %s1628_s12, %s1901_s12  }
   0x4   : > { %s1653_s18 = sadd.s32 1, %s1603_s15   ;;  %s91_s19 = sadd.s32 1, %s1599_s14 }
   0x5   : > { %s88_s20 = ssub.s32 %s1603_s15, %s1653_s18  ;;  %p101_p0 = scmp.ne.s32.totalorder %s1599_s14, %s1595_s13 }
   0x6   : > { %p89_p1 = scmp.eq.s32.totalorder %s88_s20, 0  ;;  %p102_p2 = scmp.eq.s32.totalorder %s1649_s16, 1 }
   0x7   : > { %p107_p3 = scmp.ne.s32.totalorder %s1595_s13, %s1591_s12  ;;  %p108_p4 = scmp.eq.s32.totalorder %s1174_s17, 1 }
   0x8   : > { %s1664_s21 = scalar_select %p89_p1, %s1599_s14, %s91_s19  }
   0x9   : > { %p1666_p5 = por %p102_p2, %p101_p0  ;;  %p1670_p6 = por %p108_p4, %p107_p3 }
   0xa   : > { %p1177_p7 = scmp.ge.s32.totalorder %s1603_s15, 1  ;;  %p141_p8 = scmp.lt.s32.totalorder %s1603_s15, 3 }
   0xc   : > { %p142_p9 = pnand %p1177_p7, %p141_p8 }
   0xd   : > { %v180_v0 = vld [vmem:[%s1896_s1] sm:$0xff] (!%p142_p9)  ;;  %v181_v1 = vld [vmem:[%s1896_s1 + $0x8] sm:$0xff] (!%p142_p9)  ;;  %v182_v2 = vld [vmem:[%s1896_s1 + $0x10] sm:$0xff] (!%p142_p9)  ;;  %s1179_s30 = sshll.u32 (!%p142_p9), %s1649_s16, 3  ;;  %vm184_vm0 = vcmask (!%p142_p9), 261120   ;;  %s162_s17 = sand.u32 (!%p142_p9), 1, %s1595_s13  }
   0xe   : > { %145 = sbr.rel (%p142_p9) target bundleno = 629 (0x275), region = 32  ;;  %v210_v3 = vand.u32 (!%p142_p9), 4294901760, %v180_v0  ;;  %v213_v4 = vand.u32 (!%p142_p9), 4294901760, %v181_v1  ;;  %v183_v5 = vld [vmem:[%s1896_s1 + $0x18] sm:$0xff] (!%p142_p9)  ;;  %v216_v6 = vand.u32 (!%p142_p9), 4294901760, %v182_v2  ;;  %p166_p10 = scmp.lt.s32.totalorder (!%p142_p9), %s1179_s30, 15 }
   0xf   : > { %v219_v7 = vand.u32 (!%p142_p9), 4294901760, %v183_v5  ;;  %s1178_s19 = sshll.u32 (!%p142_p9), %s162_s17, 6  ;;  %s1187_s24 = sshll.u32 (!%p142_p9), %s1649_s16, 10 }
  0x10   : > { %v1689_v8 = vpack.c.bf16 (!%p142_p9), %v213_v4, %v210_v3  ;;  %v1691_v9 = vsub.f32 (!%p142_p9), %v180_v0, %v210_v3  ;;  %v1693_v10 = vsub.f32 (!%p142_p9), %v181_v1, %v213_v4  ;;  %v1695_v11 = vsub.f32 (!%p142_p9), %v182_v2, %v216_v6  ;;  %s1833_s20 = scalar_lea.vmem (!%p142_p9), [#allocation2], %s1178_s19  ;;  %s1846_s28 = scalar_lea.hbm (!%p142_p9), %s1898_s3, %s1187_s24 }
  0x11   : > { %v1697_v12 = vpack.c.bf16 (!%p142_p9), %v219_v7, %v216_v6  ;;  %v1699_v13 = vsub.f32 (!%p142_p9), %v183_v5, %v219_v7  ;;  %s1112_s25 = sshll.u32 (!%p142_p9), %s1833_s20, 4  ;;  %s1854_s16 = scalar_lea.sflag (!%p142_p9), [#allocation3], %s162_s17  ;;  %s1848_s25 = int_to_ptr.vmem [resolvable:$true] %s1112_s25 }
  0x12   : > { %1405 = vmatprep.subr.bf16.mxu0 (!%p142_p9), %v1689_v8  ;;  %1381 = vmatprep.subr.bf16.mxu1 (!%p142_p9), %v1689_v8  ;;  %v361_v14 = vand.u32 (!%p142_p9), 4294901760, %v1691_v9  ;;  %v368_v15 = vand.u32 (!%p142_p9), 4294901760, %v1693_v10  ;;  %v375_v16 = vand.u32 (!%p142_p9), 4294901760, %v1695_v11  ;;  %s1541_s29 = scalar_lea.vmem (!%p142_p9), %s1848_s25, 1024 }
  0x13   : > { %1407 = vmatpush3.bf16.msra.mxu0 (!%p142_p9), %v1689_v8  ;;  %1383 = vmatpush3.bf16.msra.mxu1 (!%p142_p9), %v1689_v8  ;;  %v382_v23 = vand.u32 (!%p142_p9), 4294901760, %v1699_v13  ;;  %p1542_p11 = scmp.ne.s32.totalorder (!%p142_p9), %s1848_s25, %s1541_s29 }
  0x14   : > { %1409 = vmatprep.subr.bf16.mxu0 (!%p142_p9), %v1697_v12  ;;  %1385 = vmatprep.subr.bf16.mxu1 (!%p142_p9), %v1697_v12  ;;  %v362_v19 = vsub.f32 (!%p142_p9), %v1691_v9, %v361_v14  ;;  %v369_v20 = vsub.f32 (!%p142_p9), %v1693_v10, %v368_v15  ;;  %v1412_v22 = vpack.c.bf16 (!%p142_p9), %v368_v15, %v361_v14 }
  0x15   : > { %s1906_s30 = smov (!%p166_p10, %s1179_s30), 15  ;;  %v376_v30 = vsub.f32 %v1695_v11, %v375_v16  ;;  %v383_v51 = vsub.f32 %v1699_v13, %v382_v23  ;;  %v1416_v14 = vpack.c.bf16 %v382_v23, %v375_v16  ;;  %v1396_v16 = vpack.c.bf16 %v1693_v10, %v1691_v9  ;;  %p1543_p12 = pnand %p1542_p11, %p1666_p5 }
  0x16   : > { %s1180_s6 = sshll.u32 %s1906_s30, 3  ;;  %v363_v33 = vand.u32 4294901760, %v362_v19  ;;  %v370_v34 = vand.u32 4294901760, %v369_v20  ;;  %v1400_v9 = vpack.c.bf16 %v1699_v13, %v1695_v11  ;;  %v1181_v13 = vld [vmem:[%s1897_s2] ss:$0 sm:$0xff]  ;;  %s1605_s30 = smov [#allocation2]  }
  0x17   : > { %s1711_s9 = scalar_lea.vmem %s1895_s0, %s1180_s6  ;;  %1411 = vmatpush3.bf16.msra.mxu0 %v1697_v12  ;;  %1387 = vmatpush3.bf16.msra.mxu1 %v1697_v12  ;;  %v377_v47 = vand.u32 4294901760, %v376_v30  ;;  %v384_v59 = vand.u32 4294901760, %v383_v51  ;;  %p1544_p13 = pneg %p1543_p12 }
  0x18   : > { %v172_v17 = vld [vmem:[%s1711_s9] sm:$0xff]  ;;  %v173_v18 = vld [vmem:[%s1711_s9 + $0x8] sm:$0xff]  ;;  %v174_v21 = vld [vmem:[%s1711_s9 + $0x10] sm:$0xff]  ;;  %v1388_v41 = vpack.c.bf16 %v370_v34, %v363_v33  ;;  %1413 = vmatprep.subr.bf16.mxu0 %v1412_v22  ;;  %s1545_s4 = sshll.u32 %s1605_s30, 4  ;;  %s1546_s4 = int_to_ptr.vmem [resolvable:$false] %s1545_s4 }
  0x19   : > { %v186_v24 = vsel %vm184_vm0, %v172_v17, 0  ;;  %v189_v25 = vsel %vm184_vm0, %v173_v18, 0  ;;  %v192_v26 = vsel %vm184_vm0, %v174_v21, 0  ;;  %v175_v27 = vld [vmem:[%s1711_s9 + $0x18] sm:$0xff]  ;;  %v176_v28 = vld [vmem:[%s1711_s9 + $0x20] sm:$0xff]  ;;  %v177_v29 = vld [vmem:[%s1711_s9 + $0x28] sm:$0xff]  ;;  %v1392_v6 = vpack.c.bf16 %v384_v59, %v377_v47  ;;  %p1548_p0 = scmp.lt.s32.totalorder %s1848_s25, %s1546_s4 }
  0x1a   : > { %v1730_v31 = vand.u32 4294901760, %v186_v24  ;;  %v1732_v32 = vand.u32 4294901760, %v189_v25  ;;  %v1736_v35 = vand.u32 4294901760, %v192_v26  ;;  %v195_v36 = vsel %vm184_vm0, %v175_v27, 0  ;;  %v178_v43 = vld [vmem:[%s1711_s9 + $0x30] sm:$0xff]  ;;  %1389 = vmatprep.subr.bf16.mxu1 %v1388_v41  ;;  %v179_v0 = vld [vmem:[%s1711_s9 + $0x38] sm:$0xff] }
  0x1b   : > { %v198_v37 = vsel %vm184_vm0, %v176_v28, 0  ;;  %v201_v38 = vsel %vm184_vm0, %v177_v29, 0  ;;  %v1747_v42 = vand.u32 4294901760, %v195_v36  ;;  %v204_v55 = vsel %vm184_vm0, %v178_v43, 0  ;;  %s1547_s5 = scalar_lea.vmem %s1546_s4, 2048 }
  0x1c   : > { %v1742_v39 = vsub.f32 %v186_v24, %v1730_v31  ;;  %v1745_v40 = vsub.f32 %v189_v25, %v1732_v32  ;;  %v1751_v44 = vsub.f32 %v192_v26, %v1736_v35  ;;  %v1753_v45 = vand.u32 4294901760, %v198_v37  ;;  %p1549_p1 = scmp.lt.s32.totalorder %s1547_s5, %s1541_s29 }
  0x1d   : > { %v1755_v46 = vand.u32 4294901760, %v201_v38  ;;  %v1760_v50 = vsub.f32 %v195_v36, %v1747_v42  ;;  %v1777_v63 = vand.u32 4294901760, %v204_v55  ;;  %v207_v15 = vsel %vm184_vm0, %v179_v0, 0 }
  0x1e   : > { %v280_v48 = vand.u32 4294901760, %v1742_v39  ;;  %v290_v49 = vand.u32 4294901760, %v1745_v40  ;;  %v300_v52 = vand.u32 4294901760, %v1751_v44  ;;  %v1765_v53 = vsub.f32 %v198_v37, %v1753_v45  ;;  %p1550_p2 = por %p1549_p1, %p1548_p0 }
  0x1f   : > { %v1768_v54 = vsub.f32 %v201_v38, %v1755_v46  ;;  %v310_v58 = vand.u32 4294901760, %v1760_v50  ;;  %v1783_v7 = vsub.f32 %v204_v55, %v1777_v63  ;;  %v348_v20 = vand.u32 4294901760, %v207_v15 }
  0x20   : > { %1328 = vmatprep.mubr.f32.mxu0 %v280_v48  ;;  %v281_v56 = vsub.f32 %v1742_v39, %v280_v48  ;;  %v291_v57 = vsub.f32 %v1745_v40, %v290_v49  ;;  %v301_v60 = vsub.f32 %v1751_v44, %v300_v52  ;;  %v320_v61 = vand.u32 4294901760, %v1765_v53  ;;  %p1551_p3 = pnand %p1550_p2, %p1544_p13 }
  0x21   : > { %1329 = vmatmul.mubr.f32.vlgmr.msra.gmra.mrb[0].mxu0 %v290_v49  ;;  %v330_v62 = vand.u32 4294901760, %v1768_v54  ;;  %v311_v3 = vsub.f32 %v1760_v50, %v310_v58  ;;  %v340_v18 = vand.u32 4294901760, %v1783_v7 }
  0x22   : > { %v282_v1 = vand.u32 4294901760, %v281_v56  ;;  %1331 = vmatprep.mubr.f32.mxu0 %v300_v52  ;;  %v292_v2 = vand.u32 4294901760, %v291_v57  ;;  %1415 = vmatpush3.bf16.msra.mxu0 %v1412_v22  ;;  %v302_v4 = vand.u32 4294901760, %v301_v60  ;;  %v321_v5 = vsub.f32 %v1765_v53, %v320_v61 }
  0x23   : > { %v312_v17 = vand.u32 4294901760, %v311_v3  ;;  %v331_v19 = vsub.f32 %v1768_v54, %v330_v62  ;;  %v349_v22 = vsub.f32 %v207_v15, %v348_v20  ;;  %v341_v24 = vsub.f32 %v1783_v7, %v340_v18  ;;  %1417 = vmatprep.subr.bf16.mxu0 %v1416_v14 }
  0x24   : > { %1268 = vmatprep.mubr.f32.mxu1 %v282_v1  ;;  %v322_v21 = vand.u32 4294901760, %v321_v5 }
  0x25   : > { %1269 = vmatmul.mubr.f32.vlgmr.msra.gmra.mrb[0].mxu1 %v292_v2  ;;  %1332 = vmatmul.mubr.f32.gmra.mrb[2].mxu0 %v310_v58  ;;  %v332_v23 = vand.u32 4294901760, %v331_v19  ;;  %v350_v25 = vand.u32 4294901760, %v349_v22  ;;  %v342_v26 = vand.u32 4294901760, %v341_v24 }
  0x26   : > { %1391 = vmatpush3.bf16.msra.mxu1 %v1388_v41  ;;  %1271 = vmatprep.mubr.f32.mxu1 %v302_v4 }
  0x27   : > { %1334 = vmatprep.mubr.f32.mxu0 %v320_v61  ;;  %1393 = vmatprep.subr.bf16.mxu1 %v1392_v6  ;;  %v351_v27 = vsub.f32 %v349_v22, %v350_v25 }
  0x28   : > { %1419 = vmatpush3.bf16.msra.mxu0 %v1416_v14 }
  0x29   : > { %1272 = vmatmul.mubr.f32.gmra.mrb[2].mxu1 %v312_v17  ;;  %1335 = vmatmul.mubr.f32.gmra.mrb[4].mxu0 %v330_v62  ;;  %v352_v28 = vand.u32 4294901760, %v351_v27 }
  0x2a   : > { %1274 = vmatprep.mubr.f32.mxu1 %v322_v21  ;;  %1337 = vmatprep.mubr.f32.mxu0 %v340_v18 }
  0x2b   : > { %1395 = vmatpush3.bf16.msra.mxu1 %v1392_v6  ;;  %1421 = vmatprep.subr.bf16.mxu0 %v1689_v8 }
  0x2c   : > { %1397 = vmatprep.subr.bf16.mxu1 %v1396_v16 }
  0x2d   : > { %1275 = vmatmul.mubr.f32.gmra.mrb[4].mxu1 %v332_v23  ;;  %1338 = vmatmul.mubr.f32.gmra.mrb[6].mxu0 %v350_v25 }
  0x2e   : > { %1277 = vmatprep.mubr.f32.mxu1 %v342_v26  ;;  %1348 = vmatprep.mubr.f32.mxu0 %v1730_v31 }
  0x31   : > { %1278 = vmatmul.mubr.f32.gmra.mrb[6].mxu1 %v352_v28  ;;  %1349 = vmatmul.mubr.f32.vlgmr.msra.gmra.mrb[0].mxu0 %v1732_v32 }
  0x32   : > { %1288 = vmatprep.mubr.f32.mxu1 %v1730_v31  ;;  %1351 = vmatprep.mubr.f32.mxu0 %v1736_v35 }
  0x33   : > { %1423 = vmatpush3.bf16.msra.mxu0 %v1689_v8 }
  0x34   : > { %1425 = vmatprep.subr.bf16.mxu0 %v1697_v12 }
  0x35   : > { %1289 = vmatmul.mubr.f32.vlgmr.msra.gmra.mrb[0].mxu1 %v1732_v32  ;;  %1352 = vmatmul.mubr.f32.gmra.mrb[2].mxu0 %v1747_v42 }
  0x36   : > { %1399 = vmatpush3.bf16.msra.mxu1 %v1396_v16  ;;  %1291 = vmatprep.mubr.f32.mxu1 %v1736_v35 }
  0x37   : > { %1354 = vmatprep.mubr.f32.mxu0 %v1753_v45  ;;  %1401 = vmatprep.subr.bf16.mxu1 %v1400_v9 }
  0x38   : > { %1427 = vmatpush3.bf16.msra.mxu0 %v1697_v12 }
  0x39   : > { %1292 = vmatmul.mubr.f32.gmra.mrb[2].mxu1 %v1747_v42  ;;  %1355 = vmatmul.mubr.f32.gmra.mrb[4].mxu0 %v1755_v46 }
  0x3a   : > { %1294 = vmatprep.mubr.f32.mxu1 %v1753_v45  ;;  %1357 = vmatprep.mubr.f32.mxu0 %v1777_v63 }
  0x3b   : > { %1403 = vmatpush3.bf16.msra.mxu1 %v1400_v9 }
  0x3d   : > { %1295 = vmatmul.mubr.f32.gmra.mrb[4].mxu1 %v1755_v46  ;;  %1358 = vmatmul.mubr.f32.gmra.mrb[6].mxu0 %v348_v20 }
  0x3e   : > { %1297 = vmatprep.mubr.f32.mxu1 %v1777_v63  ;;  %1368 = vmatprep.mubr.f32.mxu0 %v1730_v31 }
  0x41   : > { %1298 = vmatmul.mubr.f32.gmra.mrb[6].mxu1 %v348_v20  ;;  %1369 = vmatmul.mubr.f32.vlgmr.msra.gmra.mrb[0].mxu0 %v1732_v32 }
  0x42   : > { %1308 = vmatprep.mubr.f32.mxu1 %v1742_v39  ;;  %1371 = vmatprep.mubr.f32.mxu0 %v1736_v35 }
  0x45   : > { %1309 = vmatmul.mubr.f32.vlgmr.msra.gmra.mrb[0].mxu1 %v1745_v40  ;;  %1372 = vmatmul.mubr.f32.gmra.mrb[2].mxu0 %v1747_v42 }
  0x46   : > { %1311 = vmatprep.mubr.f32.mxu1 %v1751_v44  ;;  %1374 = vmatprep.mubr.f32.mxu0 %v1753_v45 }
  0x49   : > { %1312 = vmatmul.mubr.f32.gmra.mrb[2].mxu1 %v1760_v50  ;;  %1375 = vmatmul.mubr.f32.gmra.mrb[4].mxu0 %v1755_v46 }
  0x4a   : > { %1314 = vmatprep.mubr.f32.mxu1 %v1765_v53  ;;  %1377 = vmatprep.mubr.f32.mxu0 %v1777_v63 }
  0x4d   : > { %1315 = vmatmul.mubr.f32.gmra.mrb[4].mxu1 %v1768_v54  ;;  %1378 = vmatmul.mubr.f32.gmra.mrb[6].mxu0 %v348_v20 }
  0x4e   : > { %1317 = vmatprep.mubr.f32.mxu1 %v1783_v7 }
  0x51   : > { %1318 = vmatmul.mubr.f32.gmra.mrb[6].mxu1 %v349_v22 }
 0x114   : > { %v1370_v8 = vpop.f32.mrb[0].mxu0 }
 0x115   : > { %v949_v10 = vpop.f32.mrb[1].mxu0 }
 0x118   : > { %v1310_v11 = vpop.f32.mrb[0].mxu1  ;;  %v1373_v12 = vpop.f32.mrb[2].mxu0 }
 0x119   : > { %v1428_v29 = vadd.f32 %v1370_v8, %v1310_v11  ;;  %v567_v30 = vpop.f32.mrb[1].mxu1  ;;  %v961_v31 = vpop.f32.mrb[3].mxu0 }
 0x11a   : > { %v1429_v32 = vadd.f32 %v949_v10, %v567_v30 }
 0x11b   : > { %v1003_v33 = vadd.f32 %v1428_v29, %v1181_v13 }
 0x11c   : > { %v1313_v34 = vpop.f32.mrb[2].mxu1  ;;  %v1376_v35 = vpop.f32.mrb[4].mxu0  ;;  %v1002_v40 = vadd.f32 %v1429_v32, %v1181_v13 }
 0x11d   : > { %v1430_v36 = vadd.f32 %v1373_v12, %v1313_v34  ;;  %v973_v37 = vpop.f32.mrb[5].mxu0  ;;  %1012 = vmax.xlane.f32.xlu0 %v1003_v33  ;;  %v581_v38 = vpop.f32.mrb[3].mxu1 }
 0x11e   : > { %v1431_v39 = vadd.f32 %v961_v31, %v581_v38 }
 0x11f   : > { %v1005_v41 = vadd.f32 %v1430_v36, %v1181_v13 }
 0x120   : > { %v1316_v42 = vpop.f32.mrb[4].mxu1  ;;  %v1379_v43 = vpop.f32.mrb[6].mxu0  ;;  %v1004_v48 = vadd.f32 %v1431_v39, %v1181_v13 }
 0x121   : > { %v1432_v44 = vadd.f32 %v1376_v35, %v1316_v42  ;;  %v985_v45 = vpop.f32.mrb[7].mxu0  ;;  %1010 = vmax.xlane.f32.xlu0 %v1002_v40  ;;  %1016 = vmax.xlane.f32.xlu1 %v1005_v41  ;;  %v595_v46 = vpop.f32.mrb[5].mxu1 }
 0x122   : > { %v1433_v47 = vadd.f32 %v973_v37, %v595_v46 }
 0x123   : > { %v1007_v54 = vadd.f32 %v1432_v44, %v1181_v13 }
 0x124   : > { %v1319_v49 = vpop.f32.mrb[6].mxu1  ;;  %v1006_v50 = vadd.f32 %v1433_v47, %v1181_v13 }
 0x125   : > { %v1434_v51 = vadd.f32 %v1379_v43, %v1319_v49  ;;  %1014 = vmax.xlane.f32.xlu1 %v1004_v48  ;;  %v609_v52 = vpop.f32.mrb[7].mxu1 }
 0x126   : > { %v1435_v53 = vadd.f32 %v985_v45, %v609_v52  ;;  %1018 = vmax.xlane.f32.xlu0 %v1006_v50 }
 0x127   : > { %v1009_v56 = vadd.f32 %v1434_v51, %v1181_v13 }
 0x128   : > { %v1008_v55 = vadd.f32 %v1435_v53, %v1181_v13 }
 0x129   : > { %1020 = vmax.xlane.f32.xlu1 %v1007_v54 }
 0x12a   : > { %1022 = vmax.xlane.f32.xlu0 %v1008_v55 }
 0x12d   : > { %1024 = vmax.xlane.f32.xlu1 %v1009_v56 }
 0x1aa   : > { %v1013_v57 = vpop.xlane.xlu0 %1012 }
 0x1ab   : > { %v1027_v58 = vsub.f32 %v1003_v33, %v1013_v57 }
 0x1ad   : > { %v1036_v59 = vmul.f32 1.442695, %v1027_v58 }
 0x1ae   : > { %v1011_v60 = vpop.xlane.xlu0 %1010  ;;  %v1017_v61 = vpop.xlane.xlu1 %1016 }
 0x1af   : > { %1509 = vpow2.f32 %v1036_v59  ;;  %v1026_v62 = vsub.f32 %v1002_v40, %v1011_v60  ;;  %v1029_v63 = vsub.f32 %v1005_v41, %v1017_v61 }
 0x1b1   : > { %v1034_v0 = vmul.f32 1.442695, %v1026_v62  ;;  %v1040_v1 = vmul.f32 1.442695, %v1029_v63 }
 0x1b2   : > { %v1015_v2 = vpop.xlane.xlu1 %1014 }
 0x1b3   : > { %1511 = vpow2.f32 %v1034_v0  ;;  %v1028_v3 = vsub.f32 %v1004_v48, %v1015_v2  ;;  %v1019_v4 = vpop.xlane.xlu0 %1018 }
 0x1b4   : > { %1513 = vpow2.f32 %v1040_v1  ;;  %v1030_v5 = vsub.f32 %v1006_v50, %v1019_v4 }
 0x1b5   : > { %v1038_v6 = vmul.f32 1.442695, %v1028_v3 }
 0x1b6   : > { %v1042_v7 = vmul.f32 1.442695, %v1030_v5  ;;  %v1021_v14 = vpop.xlane.xlu1 %1020 }
 0x1b7   : > { %1515 = vpow2.f32 %v1038_v6  ;;  %v1031_v15 = vsub.f32 %v1007_v54, %v1021_v14  ;;  %v1023_v17 = vpop.xlane.xlu0 %1022 }
 0x1b8   : > { %v1032_v18 = vsub.f32 %v1008_v55, %v1023_v17  ;;  %1517 = vpow2.f32 %v1042_v7 }
 0x1b9   : > { %v1510_v19 = vpop.eup %1509  ;;  %v1044_v20 = vmul.f32 1.442695, %v1031_v15 }
 0x1ba   : > { %v1046_v21 = vmul.f32 1.442695, %v1032_v18  ;;  %1052 = vadd.xlane.f32.xlu1 %v1510_v19  ;;  %v1025_v22 = vpop.xlane.xlu1 %1024 }
 0x1bb   : > { %1519 = vpow2.f32 %v1044_v20  ;;  %v1033_v24 = vsub.f32 %v1009_v56, %v1025_v22 }
 0x1bc   : > { %1521 = vpow2.f32 %v1046_v21 }
 0x1bd   : > { %v1512_v16 = vpop.eup %1511  ;;  %v1048_v23 = vmul.f32 1.442695, %v1033_v24 }
 0x1be   : > { %v1514_v25 = vpop.eup %1513  ;;  %1050 = vadd.xlane.f32.xlu0 %v1512_v16 }
 0x1bf   : > { %1523 = vpow2.f32 %v1048_v23  ;;  %1056 = vadd.xlane.f32.xlu1 %v1514_v25 }
 0x1c1   : > { %v1516_v26 = vpop.eup %1515 }
 0x1c2   : > { %1054 = vadd.xlane.f32.xlu0 %v1516_v26  ;;  %v1518_v27 = vpop.eup %1517 }
 0x1c5   : > { %v1520_v28 = vpop.eup %1519 }
 0x1c6   : > { %1060 = vadd.xlane.f32.xlu1 %v1520_v28  ;;  %1058 = vadd.xlane.f32.xlu0 %v1518_v27  ;;  %v1522_v9 = vpop.eup %1521 }
 0x1c9   : > { %v1524_v8 = vpop.eup %1523 }
 0x1ca   : > { %1064 = vadd.xlane.f32.xlu1 %v1524_v8  ;;  %1062 = vadd.xlane.f32.xlu0 %v1522_v9 }
 0x247   : > { %v1053_v10 = vpop.xlane.xlu1 %1052 }
 0x248   : > { %1525 = vrcp.f32 %v1053_v10 }
 0x24b   : > { %v1051_v11 = vpop.xlane.xlu0 %1050 }
 0x24c   : > { %v1057_v12 = vpop.xlane.xlu1 %1056  ;;  %1527 = vrcp.f32 %v1051_v11 }
 0x24d   : > { %1529 = vrcp.f32 %v1057_v12 }
 0x24f   : > { %v1055_v13 = vpop.xlane.xlu0 %1054 }
 0x250   : > { %1531 = vrcp.f32 %v1055_v13 }
 0x252   : > { %v1526_v29 = vpop.eup %1525 }
 0x253   : > { %v1083_v30 = vmul.f32 %v1526_v29, %v1510_v19  ;;  %v1061_v31 = vpop.xlane.xlu1 %1060  ;;  %v1059_v32 = vpop.xlane.xlu0 %1058 }
 0x254   : > { %1533 = vrcp.f32 %v1061_v31 }
 0x255   : > { %1091 = vst [vmem:[%s1833_s20 + $0x8] sm:$0xff] %v1083_v30  ;;  %1535 = vrcp.f32 %v1059_v32 }
 0x256   : > { %v1528_v33 = vpop.eup %1527 }
 0x257   : > { %v1530_v34 = vpop.eup %1529  ;;  %v1082_v35 = vmul.f32 %v1528_v33, %v1512_v16  ;;  %v1065_v36 = vpop.xlane.xlu1 %1064 }
 0x258   : > { %v1063_v37 = vpop.xlane.xlu0 %1062  ;;  %v1085_v38 = vmul.f32 %v1530_v34, %v1514_v25  ;;  %1537 = vrcp.f32 %v1065_v36 }
 0x259   : > { %1090 = vst [vmem:[%s1833_s20] sm:$0xff] %v1082_v35  ;;  %1539 = vrcp.f32 %v1063_v37 }
 0x25a   : > { %v1532_v39 = vpop.eup %1531  ;;  %1093 = vst [vmem:[%s1833_s20 + $0x18] sm:$0xff] %v1085_v38 }
 0x25b   : > { %v1084_v40 = vmul.f32 %v1532_v39, %v1516_v26 }
 0x25d   : > { %1092 = vst [vmem:[%s1833_s20 + $0x10] sm:$0xff] %v1084_v40 }
 0x25e   : > { %v1534_v41 = vpop.eup %1533 }
 0x25f   : > { %v1536_v42 = vpop.eup %1535  ;;  %v1087_v43 = vmul.f32 %v1534_v41, %v1520_v28 }
 0x260   : > { %v1086_v44 = vmul.f32 %v1536_v42, %v1518_v27 }
 0x261   : > { %1095 = vst [vmem:[%s1833_s20 + $0x28] sm:$0xff] %v1087_v43 }
 0x262   : > { %v1538_v45 = vpop.eup %1537  ;;  %1094 = vst [vmem:[%s1833_s20 + $0x20] sm:$0xff] %v1086_v44 }
 0x263   : > { %v1540_v46 = vpop.eup %1539  ;;  %v1089_v47 = vmul.f32 %v1538_v45, %v1524_v8 }
 0x264   : > { %v1088_v48 = vmul.f32 %v1540_v46, %v1522_v9 }
 0x265   : > { %1097 = vst [vmem:[%s1833_s20 + $0x38] sm:$0xff] %v1089_v47 }
 0x266   : > { %1096 = vst [vmem:[%s1833_s20 + $0x30] sm:$0xff] %v1088_v48 }
 0x267   : > { %1554 = shalt.err (!%p1551_p3)
}
 0x268   : > { %s1555_s6 = scalar_lea.hbm %s1846_s28, 1024  ;;  %s1559_s9 = scalar_lea.hbm %s1898_s3, 2048 }
 0x269   : > { %p1556_p4 = scmp.ne.s32.totalorder %s1846_s28, %s1555_s6  ;;  %p1560_p9 = scmp.lt.u32.totalorder %s1846_s28, %s1898_s3 }
 0x26a   : > { %p1561_p10 = scmp.lt.u32.totalorder %s1559_s9, %s1555_s6  ;;  %p1563_p12 = scmp.lt.u32.totalorder %s1555_s6, %s1846_s28 }
 0x26b   : > { %p1557_p7 = pnand %p1556_p4, %p1666_p5 }
 0x26c   : > { %p1562_p11 = por %p1561_p10, %p1560_p9 }
 0x26d   : > { %p1558_p8 = pneg %p1557_p7 }
 0x26e   : > { %p1564_p13 = por %p1563_p12, %p1562_p11 }
 0x270   : > { %p1565_p0 = pnand %p1564_p13, %p1558_p8 }
 0x272   : > { %1568 = shalt.err (!%p1565_p0)
}
 0x273   : > { %s1606_s17 = smov 128   ;;  %s1607_s19 = smov 8  }
 0x274   : > { %1468 = dma.vmem_to_hbm [thread:$0]  (%p1666_p5), %s1848_s25, 1024, %s1846_s28, %s1854_s16, %s1606_s17, %s1606_s17, %s1607_s19  }
 0x275 PF: > { %p1474_p1 = scmp.ge.s32.totalorder %s1603_s15, 2  ;;  %s1127_s20 = sand.u32 1, %s1591_s12  }
 0x276   : > { %s1128_s24 = scalar_lea.sflag [#allocation3], %s1127_s20 }
 0x277   : > { %p1471_p2 = pnand %p1474_p1, %p1670_p6 }
 0x279   : > { %1586 = dma.done.wait (!%p1471_p2), %s1128_s24, 1024  }
 0x27a   : > { %1588 = vsyncadd (!%p1471_p2), %s1128_s24, 4294966272  ;;  %p13_p3 = scmp.ge.s32.totalorder %s1653_s18, 4   ;;  %s1901_s12 = smov %s1595_s13 }
 0x27b   : > { %s1902_s13 = smov %s1599_s14  ;;  %s1903_s14 = smov %s1664_s21 }
 0x27c   : > { %s1904_s15 = smov %s1653_s18  ;;  %15 = sbr.rel (!%p13_p3) target bundleno = 3 (0x3), region = 67 }
 0x283   :  { %1133 = vsyncpa [#allocation3], 1 }
 0x284   :  { %1135 = vsyncpa [#allocation3 + $0x1], 1 }

// kernel: tpu_custom_call.1
= control target key start
LH: loop header
LB: loop body
LE: loop exit
PB: predicated region body
PF: predicated region fallthrough
CT: control target
= control target key end

     0   :  { %8 = vsyncpa [#allocation3], 0  ;;  %s1895_s0 = inlined_call_operand.vmem [shape: f32[128,32], index: 0, kind: input, shape index: {}]   ;;  %s1896_s1 = inlined_call_operand.vmem [shape: f32[32,128], index: 1, kind: input, shape index: {}]   ;;  %s1897_s2 = inlined_call_operand.vmem [shape: f32[1,128], index: 2, kind: input, shape index: {}]   ;;  %s1898_s3 = inlined_call_operand.hbm [shape: f32[128,128], index: 3, kind: output, shape index: {}]  }
   0x1   :  { %10 = vsyncpa [#allocation3 + $0x1], 0  ;;  %s1628_s12 = smov 0   ;;  %s1630_s13 = smov 0  }
   0x2   :  { %s1632_s14 = smov 0   ;;  %s1634_s15 = smov 0  }
   0x3 LB: > { %s1649_s16 = sadd.s32 4294967295, %s1603_s15   ;;  %s1174_s17 = sadd.s32 4294967294, %s1603_s15   ;;  %s1603_s15 = sphi %s1634_s15, %s1904_s15   ;;  %s1599_s14 = sphi %s1632_s14, %s1903_s14   ;;  %s1595_s13 = sphi %s1630_s13, %s1902_s13   ;;  %s1591_s12 = sphi %s1628_s12, %s1901_s12  }
   0x4   : > { %s1653_s18 = sadd.s32 1, %s1603_s15   ;;  %s91_s19 = sadd.s32 1, %s1599_s14 }
   0x5   : > { %s88_s20 = ssub.s32 %s1603_s15, %s1653_s18  ;;  %p101_p0 = scmp.ne.s32.totalorder %s1599_s14, %s1595_s13 }
   0x6   : > { %p89_p1 = scmp.eq.s32.totalorder %s88_s20, 0  ;;  %p102_p2 = scmp.eq.s32.totalorder %s1649_s16, 1 }
   0x7   : > { %p107_p3 = scmp.ne.s32.totalorder %s1595_s13, %s1591_s12  ;;  %p108_p4 = scmp.eq.s32.totalorder %s1174_s17, 1 }
   0x8   : > { %s1664_s21 = scalar_select %p89_p1, %s1599_s14, %s91_s19  }
   0x9   : > { %p1666_p5 = por %p102_p2, %p101_p0  ;;  %p1670_p6 = por %p108_p4, %p107_p3 }
   0xa   : > { %p1177_p7 = scmp.ge.s32.totalorder %s1603_s15, 1  ;;  %p141_p8 = scmp.lt.s32.totalorder %s1603_s15, 3 }
   0xc   : > { %p142_p9 = pnand %p1177_p7, %p141_p8 }
   0xd   : > { %v180_v0 = vld [vmem:[%s1896_s1] sm:$0xff] (!%p142_p9)  ;;  %v181_v1 = vld [vmem:[%s1896_s1 + $0x8] sm:$0xff] (!%p142_p9)  ;;  %v182_v2 = vld [vmem:[%s1896_s1 + $0x10] sm:$0xff] (!%p142_p9)  ;;  %s1179_s30 = sshll.u32 (!%p142_p9), %s1649_s16, 3  ;;  %vm184_vm0 = vcmask (!%p142_p9), 261120   ;;  %s162_s17 = sand.u32 (!%p142_p9), 1, %s1595_s13  }
   0xe   : > { %145 = sbr.rel (%p142_p9) target bundleno = 629 (0x275), region = 32  ;;  %v210_v3 = vand.u32 (!%p142_p9), 4294901760, %v180_v0  ;;  %v213_v4 = vand.u32 (!%p142_p9), 4294901760, %v181_v1  ;;  %v183_v5 = vld [vmem:[%s1896_s1 + $0x18] sm:$0xff] (!%p142_p9)  ;;  %v216_v6 = vand.u32 (!%p142_p9), 4294901760, %v182_v2  ;;  %p166_p10 = scmp.lt.s32.totalorder (!%p142_p9), %s1179_s30, 15 }
   0xf   : > { %v219_v7 = vand.u32 (!%p142_p9), 4294901760, %v183_v5  ;;  %s1178_s19 = sshll.u32 (!%p142_p9), %s162_s17, 6  ;;  %s1187_s24 = sshll.u32 (!%p142_p9), %s1649_s16, 10 }
  0x10   : > { %v1689_v8 = vpack.c.bf16 (!%p142_p9), %v213_v4, %v210_v3  ;;  %v1691_v9 = vsub.f32 (!%p142_p9), %v180_v0, %v210_v3  ;;  %v1693_v10 = vsub.f32 (!%p142_p9), %v181_v1, %v213_v4  ;;  %v1695_v11 = vsub.f32 (!%p142_p9), %v182_v2, %v216_v6  ;;  %s1833_s20 = scalar_lea.vmem (!%p142_p9), [#allocation2], %s1178_s19  ;;  %s1846_s28 = scalar_lea.hbm (!%p142_p9), %s1898_s3, %s1187_s24 }
  0x11   : > { %v1697_v12 = vpack.c.bf16 (!%p142_p9), %v219_v7, %v216_v6  ;;  %v1699_v13 = vsub.f32 (!%p142_p9), %v183_v5, %v219_v7  ;;  %s1112_s25 = sshll.u32 (!%p142_p9), %s1833_s20, 4  ;;  %s1854_s16 = scalar_lea.sflag (!%p142_p9), [#allocation3], %s162_s17  ;;  %s1848_s25 = int_to_ptr.vmem [resolvable:$true] %s1112_s25 }
  0x12   : > { %1405 = vmatprep.subr.bf16.mxu0 (!%p142_p9), %v1689_v8  ;;  %1381 = vmatprep.subr.bf16.mxu1 (!%p142_p9), %v1689_v8  ;;  %v361_v14 = vand.u32 (!%p142_p9), 4294901760, %v1691_v9  ;;  %v368_v15 = vand.u32 (!%p142_p9), 4294901760, %v1693_v10  ;;  %v375_v16 = vand.u32 (!%p142_p9), 4294901760, %v1695_v11  ;;  %s1541_s29 = scalar_lea.vmem (!%p142_p9), %s1848_s25, 1024 }
  0x13   : > { %1407 = vmatpush3.bf16.msra.mxu0 (!%p142_p9), %v1689_v8  ;;  %1383 = vmatpush3.bf16.msra.mxu1 (!%p142_p9), %v1689_v8  ;;  %v382_v23 = vand.u32 (!%p142_p9), 4294901760, %v1699_v13  ;;  %p1542_p11 = scmp.ne.s32.totalorder (!%p142_p9), %s1848_s25, %s1541_s29 }
  0x14   : > { %1409 = vmatprep.subr.bf16.mxu0 (!%p142_p9), %v1697_v12  ;;  %1385 = vmatprep.subr.bf16.mxu1 (!%p142_p9), %v1697_v12  ;;  %v362_v19 = vsub.f32 (!%p142_p9), %v1691_v9, %v361_v14  ;;  %v369_v20 = vsub.f32 (!%p142_p9), %v1693_v10, %v368_v15  ;;  %v1412_v22 = vpack.c.bf16 (!%p142_p9), %v368_v15, %v361_v14 }
  0x15   : > { %s1906_s30 = smov (!%p166_p10, %s1179_s30), 15  ;;  %v376_v30 = vsub.f32 %v1695_v11, %v375_v16  ;;  %v383_v51 = vsub.f32 %v1699_v13, %v382_v23  ;;  %v1416_v14 = vpack.c.bf16 %v382_v23, %v375_v16  ;;  %v1396_v16 = vpack.c.bf16 %v1693_v10, %v1691_v9  ;;  %p1543_p12 = pnand %p1542_p11, %p1666_p5 }
  0x16   : > { %s1180_s6 = sshll.u32 %s1906_s30, 3  ;;  %v363_v33 = vand.u32 4294901760, %v362_v19  ;;  %v370_v34 = vand.u32 4294901760, %v369_v20  ;;  %v1400_v9 = vpack.c.bf16 %v1699_v13, %v1695_v11  ;;  %v1181_v13 = vld [vmem:[%s1897_s2] ss:$0 sm:$0xff]  ;;  %s1605_s30 = smov [#allocation2]  }
  0x17   : > { %s1711_s9 = scalar_lea.vmem %s1895_s0, %s1180_s6  ;;  %1411 = vmatpush3.bf16.msra.mxu0 %v1697_v12  ;;  %1387 = vmatpush3.bf16.msra.mxu1 %v1697_v12  ;;  %v377_v47 = vand.u32 4294901760, %v376_v30  ;;  %v384_v59 = vand.u32 4294901760, %v383_v51  ;;  %p1544_p13 = pneg %p1543_p12 }
  0x18   : > { %v172_v17 = vld [vmem:[%s1711_s9] sm:$0xff]  ;;  %v173_v18 = vld [vmem:[%s1711_s9 + $0x8] sm:$0xff]  ;;  %v174_v21 = vld [vmem:[%s1711_s9 + $0x10] sm:$0xff]  ;;  %v1388_v41 = vpack.c.bf16 %v370_v34, %v363_v33  ;;  %1413 = vmatprep.subr.bf16.mxu0 %v1412_v22  ;;  %s1545_s4 = sshll.u32 %s1605_s30, 4  ;;  %s1546_s4 = int_to_ptr.vmem [resolvable:$false] %s1545_s4 }
  0x19   : > { %v186_v24 = vsel %vm184_vm0, %v172_v17, 0  ;;  %v189_v25 = vsel %vm184_vm0, %v173_v18, 0  ;;  %v192_v26 = vsel %vm184_vm0, %v174_v21, 0  ;;  %v175_v27 = vld [vmem:[%s1711_s9 + $0x18] sm:$0xff]  ;;  %v176_v28 = vld [vmem:[%s1711_s9 + $0x20] sm:$0xff]  ;;  %v177_v29 = vld [vmem:[%s1711_s9 + $0x28] sm:$0xff]  ;;  %v1392_v6 = vpack.c.bf16 %v384_v59, %v377_v47  ;;  %p1548_p0 = scmp.lt.s32.totalorder %s1848_s25, %s1546_s4 }
  0x1a   : > { %v1730_v31 = vand.u32 4294901760, %v186_v24  ;;  %v1732_v32 = vand.u32 4294901760, %v189_v25  ;;  %v1736_v35 = vand.u32 4294901760, %v192_v26  ;;  %v195_v36 = vsel %vm184_vm0, %v175_v27, 0  ;;  %v178_v43 = vld [vmem:[%s1711_s9 + $0x30] sm:$0xff]  ;;  %1389 = vmatprep.subr.bf16.mxu1 %v1388_v41  ;;  %v179_v0 = vld [vmem:[%s1711_s9 + $0x38] sm:$0xff] }
  0x1b   : > { %v198_v37 = vsel %vm184_vm0, %v176_v28, 0  ;;  %v201_v38 = vsel %vm184_vm0, %v177_v29, 0  ;;  %v1747_v42 = vand.u32 4294901760, %v195_v36  ;;  %v204_v55 = vsel %vm184_vm0, %v178_v43, 0  ;;  %s1547_s5 = scalar_lea.vmem %s1546_s4, 2048 }
  0x1c   : > { %v1742_v39 = vsub.f32 %v186_v24, %v1730_v31  ;;  %v1745_v40 = vsub.f32 %v189_v25, %v1732_v32  ;;  %v1751_v44 = vsub.f32 %v192_v26, %v1736_v35  ;;  %v1753_v45 = vand.u32 4294901760, %v198_v37  ;;  %p1549_p1 = scmp.lt.s32.totalorder %s1547_s5, %s1541_s29 }
  0x1d   : > { %v1755_v46 = vand.u32 4294901760, %v201_v38  ;;  %v1760_v50 = vsub.f32 %v195_v36, %v1747_v42  ;;  %v1777_v63 = vand.u32 4294901760, %v204_v55  ;;  %v207_v15 = vsel %vm184_vm0, %v179_v0, 0 }
  0x1e   : > { %v280_v48 = vand.u32 4294901760, %v1742_v39  ;;  %v290_v49 = vand.u32 4294901760, %v1745_v40  ;;  %v300_v52 = vand.u32 4294901760, %v1751_v44  ;;  %v1765_v53 = vsub.f32 %v198_v37, %v1753_v45  ;;  %p1550_p2 = por %p1549_p1, %p1548_p0 }
  0x1f   : > { %v1768_v54 = vsub.f32 %v201_v38, %v1755_v46  ;;  %v310_v58 = vand.u32 4294901760, %v1760_v50  ;;  %v1783_v7 = vsub.f32 %v204_v55, %v1777_v63  ;;  %v348_v20 = vand.u32 4294901760, %v207_v15 }
  0x20   : > { %1328 = vmatprep.mubr.f32.mxu0 %v280_v48  ;;  %v281_v56 = vsub.f32 %v1742_v39, %v280_v48  ;;  %v291_v57 = vsub.f32 %v1745_v40, %v290_v49  ;;  %v301_v60 = vsub.f32 %v1751_v44, %v300_v52  ;;  %v320_v61 = vand.u32 4294901760, %v1765_v53  ;;  %p1551_p3 = pnand %p1550_p2, %p1544_p13 }
  0x21   : > { %1329 = vmatmul.mubr.f32.vlgmr.msra.gmra.mrb[0].mxu0 %v290_v49  ;;  %v330_v62 = vand.u32 4294901760, %v1768_v54  ;;  %v311_v3 = vsub.f32 %v1760_v50, %v310_v58  ;;  %v340_v18 = vand.u32 4294901760, %v1783_v7 }
  0x22   : > { %v282_v1 = vand.u32 4294901760, %v281_v56  ;;  %1331 = vmatprep.mubr.f32.mxu0 %v300_v52  ;;  %v292_v2 = vand.u32 4294901760, %v291_v57  ;;  %1415 = vmatpush3.bf16.msra.mxu0 %v1412_v22  ;;  %v302_v4 = vand.u32 4294901760, %v301_v60  ;;  %v321_v5 = vsub.f32 %v1765_v53, %v320_v61 }
  0x23   : > { %v312_v17 = vand.u32 4294901760, %v311_v3  ;;  %v331_v19 = vsub.f32 %v1768_v54, %v330_v62  ;;  %v349_v22 = vsub.f32 %v207_v15, %v348_v20  ;;  %v341_v24 = vsub.f32 %v1783_v7, %v340_v18  ;;  %1417 = vmatprep.subr.bf16.mxu0 %v1416_v14 }
  0x24   : > { %1268 = vmatprep.mubr.f32.mxu1 %v282_v1  ;;  %v322_v21 = vand.u32 4294901760, %v321_v5 }
  0x25   : > { %1269 = vmatmul.mubr.f32.vlgmr.msra.gmra.mrb[0].mxu1 %v292_v2  ;;  %1332 = vmatmul.mubr.f32.gmra.mrb[2].mxu0 %v310_v58  ;;  %v332_v23 = vand.u32 4294901760, %v331_v19  ;;  %v350_v25 = vand.u32 4294901760, %v349_v22  ;;  %v342_v26 = vand.u32 4294901760, %v341_v24 }
  0x26   : > { %1391 = vmatpush3.bf16.msra.mxu1 %v1388_v41  ;;  %1271 = vmatprep.mubr.f32.mxu1 %v302_v4 }
  0x27   : > { %1334 = vmatprep.mubr.f32.mxu0 %v320_v61  ;;  %1393 = vmatprep.subr.bf16.mxu1 %v1392_v6  ;;  %v351_v27 = vsub.f32 %v349_v22, %v350_v25 }
  0x28   : > { %1419 = vmatpush3.bf16.msra.mxu0 %v1416_v14 }
  0x29   : > { %1272 = vmatmul.mubr.f32.gmra.mrb[2].mxu1 %v312_v17  ;;  %1335 = vmatmul.mubr.f32.gmra.mrb[4].mxu0 %v330_v62  ;;  %v352_v28 = vand.u32 4294901760, %v351_v27 }
  0x2a   : > { %1274 = vmatprep.mubr.f32.mxu1 %v322_v21  ;;  %1337 = vmatprep.mubr.f32.mxu0 %v340_v18 }
  0x2b   : > { %1395 = vmatpush3.bf16.msra.mxu1 %v1392_v6  ;;  %1421 = vmatprep.subr.bf16.mxu0 %v1689_v8 }
  0x2c   : > { %1397 = vmatprep.subr.bf16.mxu1 %v1396_v16 }
  0x2d   : > { %1275 = vmatmul.mubr.f32.gmra.mrb[4].mxu1 %v332_v23  ;;  %1338 = vmatmul.mubr.f32.gmra.mrb[6].mxu0 %v350_v25 }
  0x2e   : > { %1277 = vmatprep.mubr.f32.mxu1 %v342_v26  ;;  %1348 = vmatprep.mubr.f32.mxu0 %v1730_v31 }
  0x31   : > { %1278 = vmatmul.mubr.f32.gmra.mrb[6].mxu1 %v352_v28  ;;  %1349 = vmatmul.mubr.f32.vlgmr.msra.gmra.mrb[0].mxu0 %v1732_v32 }
  0x32   : > { %1288 = vmatprep.mubr.f32.mxu1 %v1730_v31  ;;  %1351 = vmatprep.mubr.f32.mxu0 %v1736_v35 }
  0x33   : > { %1423 = vmatpush3.bf16.msra.mxu0 %v1689_v8 }
  0x34   : > { %1425 = vmatprep.subr.bf16.mxu0 %v1697_v12 }
  0x35   : > { %1289 = vmatmul.mubr.f32.vlgmr.msra.gmra.mrb[0].mxu1 %v1732_v32  ;;  %1352 = vmatmul.mubr.f32.gmra.mrb[2].mxu0 %v1747_v42 }
  0x36   : > { %1399 = vmatpush3.bf16.msra.mxu1 %v1396_v16  ;;  %1291 = vmatprep.mubr.f32.mxu1 %v1736_v35 }
  0x37   : > { %1354 = vmatprep.mubr.f32.mxu0 %v1753_v45  ;;  %1401 = vmatprep.subr.bf16.mxu1 %v1400_v9 }
  0x38   : > { %1427 = vmatpush3.bf16.msra.mxu0 %v1697_v12 }
  0x39   : > { %1292 = vmatmul.mubr.f32.gmra.mrb[2].mxu1 %v1747_v42  ;;  %1355 = vmatmul.mubr.f32.gmra.mrb[4].mxu0 %v1755_v46 }
  0x3a   : > { %1294 = vmatprep.mubr.f32.mxu1 %v1753_v45  ;;  %1357 = vmatprep.mubr.f32.mxu0 %v1777_v63 }
  0x3b   : > { %1403 = vmatpush3.bf16.msra.mxu1 %v1400_v9 }
  0x3d   : > { %1295 = vmatmul.mubr.f32.gmra.mrb[4].mxu1 %v1755_v46  ;;  %1358 = vmatmul.mubr.f32.gmra.mrb[6].mxu0 %v348_v20 }
  0x3e   : > { %1297 = vmatprep.mubr.f32.mxu1 %v1777_v63  ;;  %1368 = vmatprep.mubr.f32.mxu0 %v1730_v31 }
  0x41   : > { %1298 = vmatmul.mubr.f32.gmra.mrb[6].mxu1 %v348_v20  ;;  %1369 = vmatmul.mubr.f32.vlgmr.msra.gmra.mrb[0].mxu0 %v1732_v32 }
  0x42   : > { %1308 = vmatprep.mubr.f32.mxu1 %v1742_v39  ;;  %1371 = vmatprep.mubr.f32.mxu0 %v1736_v35 }
  0x45   : > { %1309 = vmatmul.mubr.f32.vlgmr.msra.gmra.mrb[0].mxu1 %v1745_v40  ;;  %1372 = vmatmul.mubr.f32.gmra.mrb[2].mxu0 %v1747_v42 }
  0x46   : > { %1311 = vmatprep.mubr.f32.mxu1 %v1751_v44  ;;  %1374 = vmatprep.mubr.f32.mxu0 %v1753_v45 }
  0x49   : > { %1312 = vmatmul.mubr.f32.gmra.mrb[2].mxu1 %v1760_v50  ;;  %1375 = vmatmul.mubr.f32.gmra.mrb[4].mxu0 %v1755_v46 }
  0x4a   : > { %1314 = vmatprep.mubr.f32.mxu1 %v1765_v53  ;;  %1377 = vmatprep.mubr.f32.mxu0 %v1777_v63 }
  0x4d   : > { %1315 = vmatmul.mubr.f32.gmra.mrb[4].mxu1 %v1768_v54  ;;  %1378 = vmatmul.mubr.f32.gmra.mrb[6].mxu0 %v348_v20 }
  0x4e   : > { %1317 = vmatprep.mubr.f32.mxu1 %v1783_v7 }
  0x51   : > { %1318 = vmatmul.mubr.f32.gmra.mrb[6].mxu1 %v349_v22 }
 0x114   : > { %v1370_v8 = vpop.f32.mrb[0].mxu0 }
 0x115   : > { %v949_v10 = vpop.f32.mrb[1].mxu0 }
 0x118   : > { %v1310_v11 = vpop.f32.mrb[0].mxu1  ;;  %v1373_v12 = vpop.f32.mrb[2].mxu0 }
 0x119   : > { %v1428_v29 = vadd.f32 %v1370_v8, %v1310_v11  ;;  %v567_v30 = vpop.f32.mrb[1].mxu1  ;;  %v961_v31 = vpop.f32.mrb[3].mxu0 }
 0x11a   : > { %v1429_v32 = vadd.f32 %v949_v10, %v567_v30 }
 0x11b   : > { %v1003_v33 = vadd.f32 %v1428_v29, %v1181_v13 }
 0x11c   : > { %v1313_v34 = vpop.f32.mrb[2].mxu1  ;;  %v1376_v35 = vpop.f32.mrb[4].mxu0  ;;  %v1002_v40 = vadd.f32 %v1429_v32, %v1181_v13 }
 0x11d   : > { %v1430_v36 = vadd.f32 %v1373_v12, %v1313_v34  ;;  %v973_v37 = vpop.f32.mrb[5].mxu0  ;;  %1012 = vmax.xlane.f32.xlu0 %v1003_v33  ;;  %v581_v38 = vpop.f32.mrb[3].mxu1 }
 0x11e   : > { %v1431_v39 = vadd.f32 %v961_v31, %v581_v38 }
 0x11f   : > { %v1005_v41 = vadd.f32 %v1430_v36, %v1181_v13 }
 0x120   : > { %v1316_v42 = vpop.f32.mrb[4].mxu1  ;;  %v1379_v43 = vpop.f32.mrb[6].mxu0  ;;  %v1004_v48 = vadd.f32 %v1431_v39, %v1181_v13 }
 0x121   : > { %v1432_v44 = vadd.f32 %v1376_v35, %v1316_v42  ;;  %v985_v45 = vpop.f32.mrb[7].mxu0  ;;  %1010 = vmax.xlane.f32.xlu0 %v1002_v40  ;;  %1016 = vmax.xlane.f32.xlu1 %v1005_v41  ;;  %v595_v46 = vpop.f32.mrb[5].mxu1 }
 0x122   : > { %v1433_v47 = vadd.f32 %v973_v37, %v595_v46 }
 0x123   : > { %v1007_v54 = vadd.f32 %v1432_v44, %v1181_v13 }
 0x124   : > { %v1319_v49 = vpop.f32.mrb[6].mxu1  ;;  %v1006_v50 = vadd.f32 %v1433_v47, %v1181_v13 }
 0x125   : > { %v1434_v51 = vadd.f32 %v1379_v43, %v1319_v49  ;;  %1014 = vmax.xlane.f32.xlu1 %v1004_v48  ;;  %v609_v52 = vpop.f32.mrb[7].mxu1 }
 0x126   : > { %v1435_v53 = vadd.f32 %v985_v45, %v609_v52  ;;  %1018 = vmax.xlane.f32.xlu0 %v1006_v50 }
 0x127   : > { %v1009_v56 = vadd.f32 %v1434_v51, %v1181_v13 }
 0x128   : > { %v1008_v55 = vadd.f32 %v1435_v53, %v1181_v13 }
 0x129   : > { %1020 = vmax.xlane.f32.xlu1 %v1007_v54 }
 0x12a   : > { %1022 = vmax.xlane.f32.xlu0 %v1008_v55 }
 0x12d   : > { %1024 = vmax.xlane.f32.xlu1 %v1009_v56 }
 0x1aa   : > { %v1013_v57 = vpop.xlane.xlu0 %1012 }
 0x1ab   : > { %v1027_v58 = vsub.f32 %v1003_v33, %v1013_v57 }
 0x1ad   : > { %v1036_v59 = vmul.f32 1.442695, %v1027_v58 }
 0x1ae   : > { %v1011_v60 = vpop.xlane.xlu0 %1010  ;;  %v1017_v61 = vpop.xlane.xlu1 %1016 }
 0x1af   : > { %1509 = vpow2.f32 %v1036_v59  ;;  %v1026_v62 = vsub.f32 %v1002_v40, %v1011_v60  ;;  %v1029_v63 = vsub.f32 %v1005_v41, %v1017_v61 }
 0x1b1   : > { %v1034_v0 = vmul.f32 1.442695, %v1026_v62  ;;  %v1040_v1 = vmul.f32 1.442695, %v1029_v63 }
 0x1b2   : > { %v1015_v2 = vpop.xlane.xlu1 %1014 }
 0x1b3   : > { %1511 = vpow2.f32 %v1034_v0  ;;  %v1028_v3 = vsub.f32 %v1004_v48, %v1015_v2  ;;  %v1019_v4 = vpop.xlane.xlu0 %1018 }
 0x1b4   : > { %1513 = vpow2.f32 %v1040_v1  ;;  %v1030_v5 = vsub.f32 %v1006_v50, %v1019_v4 }
 0x1b5   : > { %v1038_v6 = vmul.f32 1.442695, %v1028_v3 }
 0x1b6   : > { %v1042_v7 = vmul.f32 1.442695, %v1030_v5  ;;  %v1021_v14 = vpop.xlane.xlu1 %1020 }
 0x1b7   : > { %1515 = vpow2.f32 %v1038_v6  ;;  %v1031_v15 = vsub.f32 %v1007_v54, %v1021_v14  ;;  %v1023_v17 = vpop.xlane.xlu0 %1022 }
 0x1b8   : > { %v1032_v18 = vsub.f32 %v1008_v55, %v1023_v17  ;;  %1517 = vpow2.f32 %v1042_v7 }
 0x1b9   : > { %v1510_v19 = vpop.eup %1509  ;;  %v1044_v20 = vmul.f32 1.442695, %v1031_v15 }
 0x1ba   : > { %v1046_v21 = vmul.f32 1.442695, %v1032_v18  ;;  %1052 = vadd.xlane.f32.xlu1 %v1510_v19  ;;  %v1025_v22 = vpop.xlane.xlu1 %1024 }
 0x1bb   : > { %1519 = vpow2.f32 %v1044_v20  ;;  %v1033_v24 = vsub.f32 %v1009_v56, %v1025_v22 }
 0x1bc   : > { %1521 = vpow2.f32 %v1046_v21 }
 0x1bd   : > { %v1512_v16 = vpop.eup %1511  ;;  %v1048_v23 = vmul.f32 1.442695, %v1033_v24 }
 0x1be   : > { %v1514_v25 = vpop.eup %1513  ;;  %1050 = vadd.xlane.f32.xlu0 %v1512_v16 }
 0x1bf   : > { %1523 = vpow2.f32 %v1048_v23  ;;  %1056 = vadd.xlane.f32.xlu1 %v1514_v25 }
 0x1c1   : > { %v1516_v26 = vpop.eup %1515 }
 0x1c2   : > { %1054 = vadd.xlane.f32.xlu0 %v1516_v26  ;;  %v1518_v27 = vpop.eup %1517 }
 0x1c5   : > { %v1520_v28 = vpop.eup %1519 }
 0x1c6   : > { %1060 = vadd.xlane.f32.xlu1 %v1520_v28  ;;  %1058 = vadd.xlane.f32.xlu0 %v1518_v27  ;;  %v1522_v9 = vpop.eup %1521 }
 0x1c9   : > { %v1524_v8 = vpop.eup %1523 }
 0x1ca   : > { %1064 = vadd.xlane.f32.xlu1 %v1524_v8  ;;  %1062 = vadd.xlane.f32.xlu0 %v1522_v9 }
 0x247   : > { %v1053_v10 = vpop.xlane.xlu1 %1052 }
 0x248   : > { %1525 = vrcp.f32 %v1053_v10 }
 0x24b   : > { %v1051_v11 = vpop.xlane.xlu0 %1050 }
 0x24c   : > { %v1057_v12 = vpop.xlane.xlu1 %1056  ;;  %1527 = vrcp.f32 %v1051_v11 }
 0x24d   : > { %1529 = vrcp.f32 %v1057_v12 }
 0x24f   : > { %v1055_v13 = vpop.xlane.xlu0 %1054 }
 0x250   : > { %1531 = vrcp.f32 %v1055_v13 }
 0x252   : > { %v1526_v29 = vpop.eup %1525 }
 0x253   : > { %v1083_v30 = vmul.f32 %v1526_v29, %v1510_v19  ;;  %v1061_v31 = vpop.xlane.xlu1 %1060  ;;  %v1059_v32 = vpop.xlane.xlu0 %1058 }
 0x254   : > { %1533 = vrcp.f32 %v1061_v31 }
 0x255   : > { %1091 = vst [vmem:[%s1833_s20 + $0x8] sm:$0xff] %v1083_v30  ;;  %1535 = vrcp.f32 %v1059_v32 }
 0x256   : > { %v1528_v33 = vpop.eup %1527 }
 0x257   : > { %v1530_v34 = vpop.eup %1529  ;;  %v1082_v35 = vmul.f32 %v1528_v33, %v1512_v16  ;;  %v1065_v36 = vpop.xlane.xlu1 %1064 }
 0x258   : > { %v1063_v37 = vpop.xlane.xlu0 %1062  ;;  %v1085_v38 = vmul.f32 %v1530_v34, %v1514_v25  ;;  %1537 = vrcp.f32 %v1065_v36 }
 0x259   : > { %1090 = vst [vmem:[%s1833_s20] sm:$0xff] %v1082_v35  ;;  %1539 = vrcp.f32 %v1063_v37 }
 0x25a   : > { %v1532_v39 = vpop.eup %1531  ;;  %1093 = vst [vmem:[%s1833_s20 + $0x18] sm:$0xff] %v1085_v38 }
 0x25b   : > { %v1084_v40 = vmul.f32 %v1532_v39, %v1516_v26 }
 0x25d   : > { %1092 = vst [vmem:[%s1833_s20 + $0x10] sm:$0xff] %v1084_v40 }
 0x25e   : > { %v1534_v41 = vpop.eup %1533 }
 0x25f   : > { %v1536_v42 = vpop.eup %1535  ;;  %v1087_v43 = vmul.f32 %v1534_v41, %v1520_v28 }
 0x260   : > { %v1086_v44 = vmul.f32 %v1536_v42, %v1518_v27 }
 0x261   : > { %1095 = vst [vmem:[%s1833_s20 + $0x28] sm:$0xff] %v1087_v43 }
 0x262   : > { %v1538_v45 = vpop.eup %1537  ;;  %1094 = vst [vmem:[%s1833_s20 + $0x20] sm:$0xff] %v1086_v44 }
 0x263   : > { %v1540_v46 = vpop.eup %1539  ;;  %v1089_v47 = vmul.f32 %v1538_v45, %v1524_v8 }
 0x264   : > { %v1088_v48 = vmul.f32 %v1540_v46, %v1522_v9 }
 0x265   : > { %1097 = vst [vmem:[%s1833_s20 + $0x38] sm:$0xff] %v1089_v47 }
 0x266   : > { %1096 = vst [vmem:[%s1833_s20 + $0x30] sm:$0xff] %v1088_v48 }
 0x267   : > { %1554 = shalt.err (!%p1551_p3)
}
 0x268   : > { %s1555_s6 = scalar_lea.hbm %s1846_s28, 1024  ;;  %s1559_s9 = scalar_lea.hbm %s1898_s3, 2048 }
 0x269   : > { %p1556_p4 = scmp.ne.s32.totalorder %s1846_s28, %s1555_s6  ;;  %p1560_p9 = scmp.lt.u32.totalorder %s1846_s28, %s1898_s3 }
 0x26a   : > { %p1561_p10 = scmp.lt.u32.totalorder %s1559_s9, %s1555_s6  ;;  %p1563_p12 = scmp.lt.u32.totalorder %s1555_s6, %s1846_s28 }
 0x26b   : > { %p1557_p7 = pnand %p1556_p4, %p1666_p5 }
 0x26c   : > { %p1562_p11 = por %p1561_p10, %p1560_p9 }
 0x26d   : > { %p1558_p8 = pneg %p1557_p7 }
 0x26e   : > { %p1564_p13 = por %p1563_p12, %p1562_p11 }
 0x270   : > { %p1565_p0 = pnand %p1564_p13, %p1558_p8 }
 0x272   : > { %1568 = shalt.err (!%p1565_p0)
}
 0x273   : > { %s1606_s17 = smov 128   ;;  %s1607_s19 = smov 8  }
 0x274   : > { %1468 = dma.vmem_to_hbm [thread:$0]  (%p1666_p5), %s1848_s25, 1024, %s1846_s28, %s1854_s16, %s1606_s17, %s1606_s17, %s1607_s19  }
 0x275 PF: > { %p1474_p1 = scmp.ge.s32.totalorder %s1603_s15, 2  ;;  %s1127_s20 = sand.u32 1, %s1591_s12  }
 0x276   : > { %s1128_s24 = scalar_lea.sflag [#allocation3], %s1127_s20 }
 0x277   : > { %p1471_p2 = pnand %p1474_p1, %p1670_p6 }
 0x279   : > { %1586 = dma.done.wait (!%p1471_p2), %s1128_s24, 1024  }
 0x27a   : > { %1588 = vsyncadd (!%p1471_p2), %s1128_s24, 4294966272  ;;  %p13_p3 = scmp.ge.s32.totalorder %s1653_s18, 4   ;;  %s1901_s12 = smov %s1595_s13 }
 0x27b   : > { %s1902_s13 = smov %s1599_s14  ;;  %s1903_s14 = smov %s1664_s21 }
 0x27c   : > { %s1904_s15 = smov %s1653_s18  ;;  %15 = sbr.rel (!%p13_p3) target bundleno = 3 (0x3), region = 67 }
 0x283   :  { %1133 = vsyncpa [#allocation3], 1 }
 0x284   :  { %1135 = vsyncpa [#allocation3 + $0x1], 1 }

// kernel: tpu_custom_call.1
= control target key start
LH: loop header
LB: loop body
LE: loop exit
PB: predicated region body
PF: predicated region fallthrough
CT: control target
= control target key end

     0   :  { %8 = vsyncpa [#allocation3], 0  ;;  %s848_s0 = inlined_call_operand.vmem [shape: f32[128,32], index: 0, kind: input, shape index: {}]   ;;  %s849_s1 = inlined_call_operand.vmem [shape: f32[32,128], index: 1, kind: input, shape index: {}]   ;;  %s850_s2 = inlined_call_operand.vmem [shape: f32[1,128], index: 2, kind: input, shape index: {}]   ;;  %s851_s3 = inlined_call_operand.hbm [shape: f32[128,128], index: 3, kind: output, shape index: {}]  }
   0x1   :  { %10 = vsyncpa [#allocation3 + $0x1], 0  ;;  %s719_s12 = smov 0   ;;  %s721_s13 = smov 0  }
   0x2   :  { %s723_s14 = smov 0   ;;  %s725_s15 = smov 0  }
   0x3 LB: > { %s740_s16 = sadd.s32 4294967295, %s694_s15   ;;  %s493_s17 = sadd.s32 4294967294, %s694_s15   ;;  %s694_s15 = sphi %s725_s15, %s857_s15   ;;  %s690_s14 = sphi %s723_s14, %s856_s14   ;;  %s686_s13 = sphi %s721_s13, %s855_s13   ;;  %s682_s12 = sphi %s719_s12, %s854_s12  }
   0x4   : > { %s744_s18 = sadd.s32 1, %s694_s15   ;;  %s91_s19 = sadd.s32 1, %s690_s14 }
   0x5   : > { %s88_s20 = ssub.s32 %s694_s15, %s744_s18  ;;  %p101_p0 = scmp.ne.s32.totalorder %s690_s14, %s686_s13 }
   0x6   : > { %p89_p1 = scmp.eq.s32.totalorder %s88_s20, 0  ;;  %p102_p2 = scmp.eq.s32.totalorder %s740_s16, 1 }
   0x7   : > { %p107_p3 = scmp.ne.s32.totalorder %s686_s13, %s682_s12  ;;  %p108_p4 = scmp.eq.s32.totalorder %s493_s17, 1 }
   0x8   : > { %s755_s21 = scalar_select %p89_p1, %s690_s14, %s91_s19  }
   0x9   : > { %p757_p5 = por %p102_p2, %p101_p0  ;;  %p761_p6 = por %p108_p4, %p107_p3 }
   0xa   : > { %p496_p7 = scmp.ge.s32.totalorder %s694_s15, 1  ;;  %p141_p8 = scmp.lt.s32.totalorder %s694_s15, 3 }
   0xc   : > { %p142_p9 = pnand %p496_p7, %p141_p8 }
   0xd   : > { %v180_v0 = vld [vmem:[%s849_s1] sm:$0xff] (!%p142_p9)  ;;  %v181_v1 = vld [vmem:[%s849_s1 + $0x8] sm:$0xff] (!%p142_p9)  ;;  %v182_v2 = vld [vmem:[%s849_s1 + $0x10] sm:$0xff] (!%p142_p9)  ;;  %s498_s30 = sshll.u32 (!%p142_p9), %s740_s16, 3  ;;  %vm184_vm0 = vcmask (!%p142_p9), 261120   ;;  %s162_s17 = sand.u32 (!%p142_p9), 1, %s686_s13  }
   0xe   : > { %145 = sbr.rel (%p142_p9) target bundleno = 583 (0x247), region = 32  ;;  %v547_v3 = vpack.c.bf16 (!%p142_p9), %v181_v1, %v180_v0  ;;  %v183_v4 = vld [vmem:[%s849_s1 + $0x18] sm:$0xff] (!%p142_p9)  ;;  %p166_p10 = scmp.lt.s32.totalorder (!%p142_p9), %s498_s30, 15  ;;  %v508_v14 = vld [vmem:[%s850_s2] ss:$0 sm:$0xff] (!%p142_p9) }
   0xf   : > { %v551_v5 = vpack.c.bf16 (!%p142_p9), %v183_v4, %v182_v2  ;;  %s497_s19 = sshll.u32 (!%p142_p9), %s162_s17, 6  ;;  %s514_s24 = sshll.u32 (!%p142_p9), %s740_s16, 10 }
  0x10   : > { %548 = vmatprep.subr.bf16.mxu0 (!%p142_p9), %v547_v3  ;;  %555 = vmatprep.subr.bf16.mxu1 (!%p142_p9), %v547_v3  ;;  %s164_s20 = scalar_lea.vmem (!%p142_p9), [#allocation2], %s497_s19  ;;  %s801_s28 = scalar_lea.hbm (!%p142_p9), %s851_s3, %s514_s24 }
  0x11   : > { %550 = vmatpush3.bf16.msra.mxu0 (!%p142_p9), %v547_v3  ;;  %557 = vmatpush3.bf16.msra.mxu1 (!%p142_p9), %v547_v3  ;;  %s431_s25 = sshll.u32 (!%p142_p9), %s164_s20, 4  ;;  %s807_s29 = scalar_lea.sflag (!%p142_p9), [#allocation3], %s162_s17  ;;  %s803_s25 = int_to_ptr.vmem [resolvable:$true] %s431_s25 }
  0x12   : > { %552 = vmatprep.subr.bf16.mxu0 (!%p142_p9), %v551_v5  ;;  %556 = vmatprep.subr.bf16.mxu1 (!%p142_p9), %v551_v5  ;;  %s632_s16 = scalar_lea.vmem (!%p142_p9), %s803_s25, 1024 }
  0x13   : > { %p633_p11 = scmp.ne.s32.totalorder (!%p142_p9), %s803_s25, %s632_s16 }
  0x15   : > { %s859_s30 = smov (!%p166_p10, %s498_s30), 15  ;;  %554 = vmatpush3.bf16.msra.mxu0 %v551_v5  ;;  %558 = vmatpush3.bf16.msra.mxu1 %v551_v5  ;;  %p634_p12 = pnand %p633_p11, %p757_p5 }
  0x16   : > { %s499_s6 = sshll.u32 %s859_s30, 3  ;;  %s696_s30 = smov [#allocation2]  }
  0x17   : > { %s169_s9 = scalar_lea.vmem %s848_s0, %s499_s6  ;;  %p635_p13 = pneg %p634_p12 }
  0x18   : > { %v172_v6 = vld [vmem:[%s169_s9] sm:$0xff]  ;;  %v173_v8 = vld [vmem:[%s169_s9 + $0x8] sm:$0xff]  ;;  %v174_v10 = vld [vmem:[%s169_s9 + $0x10] sm:$0xff]  ;;  %s636_s4 = sshll.u32 %s696_s30, 4  ;;  %s637_s4 = int_to_ptr.vmem [resolvable:$false] %s636_s4 }
  0x19   : > { %v176_v7 = vld [vmem:[%s169_s9 + $0x20] sm:$0xff]  ;;  %v177_v9 = vld [vmem:[%s169_s9 + $0x28] sm:$0xff]  ;;  %535 = vmatprep.mubr.msk.f32.mxu0 %vm184_vm0, %v172_v6  ;;  %v178_v11 = vld [vmem:[%s169_s9 + $0x30] sm:$0xff]  ;;  %s638_s5 = scalar_lea.vmem %s637_s4, 2048  ;;  %p639_p0 = scmp.lt.s32.totalorder %s803_s25, %s637_s4 }
  0x1a   : > { %541 = vmatprep.mubr.msk.f32.mxu1 %vm184_vm0, %v176_v7  ;;  %536 = vmatmul.mubr.msk.f32.vlgmr.msra.gmra.mrb[0].mxu0 %vm184_vm0, %v173_v8  ;;  %v175_v12 = vld [vmem:[%s169_s9 + $0x18] sm:$0xff]  ;;  %p640_p1 = scmp.lt.s32.totalorder %s638_s5, %s632_s16 }
  0x1b   : > { %542 = vmatmul.mubr.msk.f32.vlgmr.msra.gmra.mrb[0].mxu1 %vm184_vm0, %v177_v9  ;;  %538 = vmatprep.mubr.msk.f32.mxu0 %vm184_vm0, %v174_v10  ;;  %v179_v13 = vld [vmem:[%s169_s9 + $0x38] sm:$0xff] }
  0x1c   : > { %544 = vmatprep.mubr.msk.f32.mxu1 %vm184_vm0, %v178_v11  ;;  %p641_p2 = por %p640_p1, %p639_p0 }
  0x1e   : > { %539 = vmatmul.mubr.msk.f32.gmra.mrb[2].mxu0 %vm184_vm0, %v175_v12  ;;  %p642_p3 = pnand %p641_p2, %p635_p13 }
  0x1f   : > { %545 = vmatmul.mubr.msk.f32.gmra.mrb[2].mxu1 %vm184_vm0, %v179_v13 }
  0xed   : > { %v537_v15 = vpop.f32.mrb[0].mxu0 }
  0xee   : > { %v543_v16 = vpop.f32.mrb[0].mxu1  ;;  %v322_v17 = vadd.f32 %v537_v15, %v508_v14  ;;  %v275_v19 = vpop.f32.mrb[1].mxu0 }
  0xef   : > { %v326_v18 = vadd.f32 %v543_v16, %v508_v14  ;;  %v295_v20 = vpop.f32.mrb[1].mxu1  ;;  %v321_v23 = vadd.f32 %v508_v14, %v275_v19 }
  0xf0   : > { %331 = vmax.xlane.f32.xlu0 %v322_v17  ;;  %v325_v28 = vadd.f32 %v508_v14, %v295_v20 }
  0xf1   : > { %339 = vmax.xlane.f32.xlu1 %v326_v18  ;;  %v540_v21 = vpop.f32.mrb[2].mxu0 }
  0xf2   : > { %v546_v22 = vpop.f32.mrb[2].mxu1  ;;  %v324_v24 = vadd.f32 %v540_v21, %v508_v14  ;;  %v285_v25 = vpop.f32.mrb[3].mxu0 }
  0xf3   : > { %v305_v26 = vpop.f32.mrb[3].mxu1  ;;  %v323_v27 = vadd.f32 %v508_v14, %v285_v25  ;;  %v328_v29 = vadd.f32 %v546_v22, %v508_v14 }
  0xf4   : > { %329 = vmax.xlane.f32.xlu0 %v321_v23  ;;  %v327_v30 = vadd.f32 %v508_v14, %v305_v26 }
  0xf5   : > { %335 = vmax.xlane.f32.xlu1 %v324_v24 }
  0xf8   : > { %337 = vmax.xlane.f32.xlu0 %v325_v28 }
  0xf9   : > { %333 = vmax.xlane.f32.xlu1 %v323_v27 }
  0xfc   : > { %341 = vmax.xlane.f32.xlu0 %v327_v30 }
  0xfd   : > { %343 = vmax.xlane.f32.xlu1 %v328_v29 }
 0x17d   : > { %v332_v32 = vpop.xlane.xlu0 %331 }
 0x17e   : > { %v340_v31 = vpop.xlane.xlu1 %339  ;;  %v346_v33 = vsub.f32 %v322_v17, %v332_v32 }
 0x17f   : > { %v350_v34 = vsub.f32 %v326_v18, %v340_v31 }
 0x180   : > { %v355_v35 = vmul.f32 1.442695, %v346_v33 }
 0x181   : > { %v330_v36 = vpop.xlane.xlu0 %329  ;;  %v363_v39 = vmul.f32 1.442695, %v350_v34 }
 0x182   : > { %v336_v37 = vpop.xlane.xlu1 %335  ;;  %v345_v38 = vsub.f32 %v321_v23, %v330_v36  ;;  %600 = vpow2.f32 %v355_v35 }
 0x183   : > { %v348_v40 = vsub.f32 %v324_v24, %v336_v37 }
 0x184   : > { %v353_v41 = vmul.f32 1.442695, %v345_v38 }
 0x185   : > { %v338_v42 = vpop.xlane.xlu0 %337  ;;  %v359_v46 = vmul.f32 1.442695, %v348_v40 }
 0x186   : > { %v334_v43 = vpop.xlane.xlu1 %333  ;;  %602 = vpow2.f32 %v353_v41  ;;  %v349_v44 = vsub.f32 %v325_v28, %v338_v42 }
 0x187   : > { %v347_v45 = vsub.f32 %v323_v27, %v334_v43  ;;  %604 = vpow2.f32 %v363_v39 }
 0x188   : > { %v361_v47 = vmul.f32 1.442695, %v349_v44 }
 0x189   : > { %v342_v48 = vpop.xlane.xlu0 %341  ;;  %v357_v50 = vmul.f32 1.442695, %v347_v45 }
 0x18a   : > { %v344_v49 = vpop.xlane.xlu1 %343  ;;  %606 = vpow2.f32 %v361_v47  ;;  %v351_v51 = vsub.f32 %v327_v30, %v342_v48 }
 0x18b   : > { %v352_v52 = vsub.f32 %v328_v29, %v344_v49  ;;  %608 = vpow2.f32 %v359_v46 }
 0x18c   : > { %v601_v54 = vpop.eup %600  ;;  %610 = vpow2.f32 %v357_v50  ;;  %v365_v55 = vmul.f32 1.442695, %v351_v51 }
 0x18d   : > { %v367_v53 = vmul.f32 1.442695, %v352_v52  ;;  %371 = vadd.xlane.f32.xlu1 %v601_v54 }
 0x18f   : > { %612 = vpow2.f32 %v367_v53 }
 0x190   : > { %v603_v56 = vpop.eup %602  ;;  %614 = vpow2.f32 %v365_v55 }
 0x191   : > { %v605_v57 = vpop.eup %604  ;;  %369 = vadd.xlane.f32.xlu0 %v603_v56 }
 0x192   : > { %379 = vadd.xlane.f32.xlu1 %v605_v57 }
 0x194   : > { %v607_v58 = vpop.eup %606 }
 0x195   : > { %v609_v59 = vpop.eup %608  ;;  %377 = vadd.xlane.f32.xlu0 %v607_v58 }
 0x196   : > { %375 = vadd.xlane.f32.xlu1 %v609_v59  ;;  %v611_v60 = vpop.eup %610 }
 0x199   : > { %v613_v61 = vpop.eup %612  ;;  %373 = vadd.xlane.f32.xlu0 %v611_v60 }
 0x19a   : > { %383 = vadd.xlane.f32.xlu1 %v613_v61  ;;  %v615_v62 = vpop.eup %614 }
 0x19d   : > { %381 = vadd.xlane.f32.xlu0 %v615_v62 }
 0x21a   : > { %v372_v63 = vpop.xlane.xlu1 %371 }
 0x21b   : > { %616 = vrcp.f32 %v372_v63 }
 0x21e   : > { %v370_v0 = vpop.xlane.xlu0 %369 }
 0x21f   : > { %618 = vrcp.f32 %v370_v0  ;;  %v380_v1 = vpop.xlane.xlu1 %379 }
 0x220   : > { %620 = vrcp.f32 %v380_v1 }
 0x222   : > { %v378_v2 = vpop.xlane.xlu0 %377 }
 0x223   : > { %622 = vrcp.f32 %v378_v2  ;;  %v376_v3 = vpop.xlane.xlu1 %375 }
 0x224   : > { %624 = vrcp.f32 %v376_v3 }
 0x225   : > { %v617_v4 = vpop.eup %616 }
 0x226   : > { %v374_v5 = vpop.xlane.xlu0 %373  ;;  %v402_v6 = vmul.f32 %v617_v4, %v601_v54 }
 0x227   : > { %626 = vrcp.f32 %v374_v5  ;;  %v384_v7 = vpop.xlane.xlu1 %383 }
 0x228   : > { %628 = vrcp.f32 %v384_v7  ;;  %410 = vst [vmem:[%s164_s20 + $0x8] sm:$0xff] %v402_v6 }
 0x229   : > { %v619_v8 = vpop.eup %618 }
 0x22a   : > { %v621_v9 = vpop.eup %620  ;;  %v401_v10 = vmul.f32 %v619_v8, %v603_v56  ;;  %v382_v11 = vpop.xlane.xlu0 %381 }
 0x22b   : > { %v406_v12 = vmul.f32 %v621_v9, %v605_v57  ;;  %630 = vrcp.f32 %v382_v11 }
 0x22c   : > { %409 = vst [vmem:[%s164_s20] sm:$0xff] %v401_v10 }
 0x22d   : > { %v623_v13 = vpop.eup %622  ;;  %414 = vst [vmem:[%s164_s20 + $0x28] sm:$0xff] %v406_v12 }
 0x22e   : > { %v625_v14 = vpop.eup %624  ;;  %v405_v15 = vmul.f32 %v623_v13, %v607_v58 }
 0x22f   : > { %v404_v16 = vmul.f32 %v625_v14, %v609_v59 }
 0x230   : > { %413 = vst [vmem:[%s164_s20 + $0x20] sm:$0xff] %v405_v15 }
 0x231   : > { %v627_v17 = vpop.eup %626  ;;  %412 = vst [vmem:[%s164_s20 + $0x18] sm:$0xff] %v404_v16 }
 0x232   : > { %v629_v18 = vpop.eup %628  ;;  %v403_v19 = vmul.f32 %v627_v17, %v611_v60 }
 0x233   : > { %v408_v20 = vmul.f32 %v629_v18, %v613_v61 }
 0x234   : > { %411 = vst [vmem:[%s164_s20 + $0x10] sm:$0xff] %v403_v19 }
 0x235   : > { %v631_v21 = vpop.eup %630  ;;  %416 = vst [vmem:[%s164_s20 + $0x38] sm:$0xff] %v408_v20 }
 0x236   : > { %v407_v22 = vmul.f32 %v631_v21, %v615_v62 }
 0x238   : > { %415 = vst [vmem:[%s164_s20 + $0x30] sm:$0xff] %v407_v22 }
 0x239   : > { %645 = shalt.err (!%p642_p3)
}
 0x23a   : > { %s646_s6 = scalar_lea.hbm %s801_s28, 1024  ;;  %s650_s9 = scalar_lea.hbm %s851_s3, 2048 }
 0x23b   : > { %p647_p4 = scmp.ne.s32.totalorder %s801_s28, %s646_s6  ;;  %p651_p9 = scmp.lt.u32.totalorder %s801_s28, %s851_s3 }
 0x23c   : > { %p652_p10 = scmp.lt.u32.totalorder %s650_s9, %s646_s6  ;;  %p654_p12 = scmp.lt.u32.totalorder %s646_s6, %s801_s28 }
 0x23d   : > { %p648_p7 = pnand %p647_p4, %p757_p5 }
 0x23e   : > { %p653_p11 = por %p652_p10, %p651_p9 }
 0x23f   : > { %p649_p8 = pneg %p648_p7 }
 0x240   : > { %p655_p13 = por %p654_p12, %p653_p11 }
 0x242   : > { %p656_p0 = pnand %p655_p13, %p649_p8 }
 0x244   : > { %659 = shalt.err (!%p656_p0)
}
 0x245   : > { %s697_s17 = smov 128   ;;  %s698_s19 = smov 8  }
 0x246   : > { %559 = dma.vmem_to_hbm [thread:$0]  (%p757_p5), %s803_s25, 1024, %s801_s28, %s807_s29, %s697_s17, %s697_s17, %s698_s19  }
 0x247 PF: > { %p565_p1 = scmp.ge.s32.totalorder %s694_s15, 2  ;;  %s446_s20 = sand.u32 1, %s682_s12  }
 0x248   : > { %s447_s24 = scalar_lea.sflag [#allocation3], %s446_s20 }
 0x249   : > { %p562_p2 = pnand %p565_p1, %p761_p6 }
 0x24b   : > { %677 = dma.done.wait (!%p562_p2), %s447_s24, 1024  }
 0x24c   : > { %679 = vsyncadd (!%p562_p2), %s447_s24, 4294966272  ;;  %p13_p3 = scmp.ge.s32.totalorder %s744_s18, 4   ;;  %s854_s12 = smov %s686_s13 }
 0x24d   : > { %s855_s13 = smov %s690_s14  ;;  %s856_s14 = smov %s755_s21 }
 0x24e   : > { %s857_s15 = smov %s744_s18  ;;  %15 = sbr.rel (!%p13_p3) target bundleno = 3 (0x3), region = 67 }
 0x255   :  { %452 = vsyncpa [#allocation3], 1 }
 0x256   :  { %454 = vsyncpa [#allocation3 + $0x1], 1 }

</bundles_post_ra>
